<compile_context>
chip_gen: v7x
topology: tpu7x:2x2x1
jax: 0.10.0
libtpu: 0.0.40
codegen_flags: <defaults>
</compile_context>

<pallas_src>
import numpy as np
import jax
import jax.numpy as jnp
from jax import lax
from jax.experimental import pallas as pl
from jax.experimental.pallas import tpu as pltpu


def _build_interp_matrix(out_size: int, in_size: int) -> np.ndarray:
    """Bilinear interpolation matrix matching F.interpolate(align_corners=False)."""
    A = np.zeros((out_size, in_size), np.float32)
    scale = in_size / out_size
    for o in range(out_size):
        src = (o + 0.5) * scale - 0.5
        src = max(src, 0.0)
        x0 = min(int(np.floor(src)), in_size - 1)
        x1 = min(x0 + 1, in_size - 1)
        w1 = src - x0
        A[o, x0] += 1.0 - w1
        A[o, x1] += w1
    return A


def _make_kernel(Q, C, h, w, H, W, threshold):
    NEG = -1e30

    def kernel(logits_ref, masks_ref, boxes_ref, is_thing_ref, ah_ref, awt_ref,
               stats_ref, mid_ref, masks_up_ref,
               mval_ref, keepb_ref, canon_ref, t_ref, area_ref):
        # ---------------- class scores / labels / keep ----------------
        # argmax over raw logits (robust to softmax rounding), score = 1 / sum
        # of shifted exps (== softmax max) -- no (Q,C) probs tensor, no divide
        # of the full row.
        logits = logits_ref[0]                                    # (Q, C)
        max_l = jnp.max(logits, axis=-1, keepdims=True)           # (Q, 1)
        sum_e = jnp.sum(jnp.exp(logits - max_l), axis=-1, keepdims=True)
        score = 1.0 / sum_e                                       # (Q, 1)
        iota_c = lax.broadcasted_iota(jnp.int32, (Q, C), 1)       # (Q, C)
        labels2d = jnp.min(jnp.where(logits == max_l, iota_c, C),
                           axis=-1, keepdims=True)                # (Q, 1) first-argmax
        keep2d = jnp.logical_and(labels2d != (C - 1),
                                 score > threshold)               # (Q, 1) bool
        keep_f = keep2d.astype(jnp.float32)

        # ---------------- boxes: cxcywh -> xyxy ----------------
        boxes = boxes_ref[0]                                      # (Q, 4)
        cx, cy = boxes[:, 0:1], boxes[:, 1:2]
        bw, bh = boxes[:, 2:3], boxes[:, 3:4]
        x0 = cx - 0.5 * bw
        y0 = cy - 0.5 * bh
        x1 = cx + 0.5 * bw
        y1 = cy + 0.5 * bh

        # ------- stuff-class dedup: canonical index per query (pre-loop) -------
        onehot = (iota_c == labels2d).astype(jnp.float32)         # (Q, C)
        thing_row = is_thing_ref[...].astype(jnp.float32)         # (1, C)
        is_stuff = jnp.sum(onehot * (1.0 - thing_row),
                           axis=-1, keepdims=True) > 0.5          # (Q, 1)
        onehot_keep = onehot * keep_f                             # (Q, C)
        # match[k, j] = (labels[k] == labels[j]) & keep[j]
        match = lax.dot_general(onehot, onehot_keep,
                                (((1,), (1,)), ((), ())),
                                preferred_element_type=jnp.float32)   # (Q, Q)
        jidx = lax.broadcasted_iota(jnp.int32, (Q, Q), 1)
        cand = jnp.min(jnp.where(match > 0.5, jidx, Q),
                       axis=1, keepdims=True)                     # (Q, 1)
        kidx = lax.broadcasted_iota(jnp.int32, (Q, 1), 0)
        canon_ref[...] = jnp.where(jnp.logical_and(is_stuff, keep2d), cand, kidx)
        # hoisted keep bias: 0 for kept queries, NEG otherwise (single VPU add
        # per pixel in the loop instead of a re-broadcast select)
        keepb_ref[...] = jnp.where(keep2d, 0.0, NEG).astype(jnp.float32)

        # -------- batched bilinear upsample, stage 1: one big MXU matmul -------
        # (Q*h, w) @ (w, W) -> (Q, h, W); bf16 inputs, f32 accumulation.
        masks_bf = masks_ref[0].reshape(Q * h, w).astype(jnp.bfloat16)
        awt_bf = awt_ref[...].astype(jnp.bfloat16)                # (w, W)
        t_all = jnp.dot(masks_bf, awt_bf, preferred_element_type=jnp.float32)
        t_ref[...] = t_all.reshape(Q, h, W).astype(jnp.bfloat16)

        ah_bf = ah_ref[...].astype(jnp.bfloat16)                  # (H, h), hoisted

        # ---- stage-2 matmul + fused argmax + fused dedup remap (pl.loop) ------
        mval_ref[...] = jnp.full((H, W), NEG, jnp.float32)
        mid_ref[0] = jnp.zeros((H, W), jnp.int32)

        @pl.loop(0, Q)
        def _(q):
            up = jnp.dot(ah_bf, t_ref[q],
                         preferred_element_type=jnp.float32)      # (H, W) f32
            masks_up_ref[0, pl.ds(q, 1)] = up[None].astype(masks_up_ref.dtype)
            kb = keepb_ref[pl.ds(q, 1), :]                        # (1, 1) 0 or NEG
            cq = canon_ref[pl.ds(q, 1), :]                        # (1, 1) i32
            masked = up + kb                                      # f32 compare domain
            mval = mval_ref[...]
            mid = mid_ref[0]
            better = masked > mval
            mid_ref[0] = jnp.where(better, cq, mid)               # dedup fused here
            mval_ref[...] = jnp.where(better, masked, mval)

        # -------- per-query segment areas (no (Q,H,W) intermediate) ------------
        @pl.loop(0, Q)
        def _(q):
            eq = (mid_ref[0] == q).astype(jnp.float32)            # (H, W)
            cnt = jnp.sum(jnp.sum(eq, axis=1, keepdims=True),
                          axis=0, keepdims=True)                  # (1, 1)
            area_ref[pl.ds(q, 1), :] = cnt

        # -------- pack all lane-narrow per-query outputs into one slab ---------
        # columns: [score, label, keep, area, x0, y0, x1, y1]
        stats_ref[0] = jnp.concatenate(
            [score, labels2d.astype(jnp.float32), keep_f, area_ref[...],
             x0, y0, x1, y1], axis=-1)                            # (Q, 8)

    return kernel


def post_process_panoptic(pred_logits, pred_masks, pred_boxes, is_thing,
                          processed_size, threshold=0.85):
    B, Q, C = pred_logits.shape
    _, _, h, w = pred_masks.shape
    H, W = processed_size

    a_h = jnp.asarray(_build_interp_matrix(H, h))            # (H, h)
    a_wt = jnp.asarray(_build_interp_matrix(W, w).T)          # (w, W)

    kernel = _make_kernel(Q, C, h, w, H, W, threshold)

    out_shape = (
        jax.ShapeDtypeStruct((B, Q, 8), jnp.float32),    # packed per-query stats
        jax.ShapeDtypeStruct((B, H, W), jnp.int32),      # per-pixel segment id
        jax.ShapeDtypeStruct((B, Q, H, W), jnp.bfloat16),  # upsampled masks (bf16)
    )

    grid_spec = pltpu.PrefetchScalarGridSpec(
        num_scalar_prefetch=0,
        grid=(B,),
        in_specs=[
            pl.BlockSpec((1, Q, C), lambda b: (b, 0, 0)),
            pl.BlockSpec((1, Q, h, w), lambda b: (b, 0, 0, 0)),
            pl.BlockSpec((1, Q, 4), lambda b: (b, 0, 0)),
            pl.BlockSpec((1, C), lambda b: (0, 0)),
            pl.BlockSpec((H, h), lambda b: (0, 0)),
            pl.BlockSpec((w, W), lambda b: (0, 0)),
        ],
        out_specs=[
            pl.BlockSpec((1, Q, 8), lambda b: (b, 0, 0)),
            pl.BlockSpec((1, H, W), lambda b: (b, 0, 0)),
            pl.BlockSpec((1, Q, H, W), lambda b: (b, 0, 0, 0)),
        ],
        scratch_shapes=[
            pltpu.VMEM((H, W), jnp.float32),       # running argmax value
            pltpu.VMEM((Q, 1), jnp.float32),       # keep bias (0 / NEG)
            pltpu.VMEM((Q, 1), jnp.int32),         # canonical (dedup) index
            pltpu.VMEM((Q, h, W), jnp.bfloat16),   # stage-1 matmul result
            pltpu.VMEM((Q, 1), jnp.float32),       # per-query areas
        ],
    )

    return pl.pallas_call(
        kernel,
        out_shape=out_shape,
        grid_spec=grid_spec,
        compiler_params=pltpu.CompilerParams(
            dimension_semantics=("parallel",),
            # safe on v5e/v6e/v7x; raise (v5e/v6e) or add a Q tile (v7x) for
            # production-scale Q/H/W.
            vmem_limit_bytes=64 * 1024 * 1024),
    )(pred_logits, pred_masks, pred_boxes, is_thing, a_h, a_wt)


if __name__ == "__main__":
    # Small deterministic example consistent with DETR's panoptic head.
    B, Q, C = 2, 8, 16          # C includes the trailing "no object" class
    h, w = 16, 16               # raw mask resolution
    H, W = 32, 32               # processed (pre-batch) image size

    key = jax.random.PRNGKey(0)
    k1, k2, k3 = jax.random.split(key, 3)
    # Scale logits so the softmax is peaked and some queries pass the 0.85 threshold.
    pred_logits = 4.0 * jax.random.normal(k1, (B, Q, C), jnp.float32)
    pred_masks = jax.random.normal(k2, (B, Q, h, w), jnp.float32)
    pred_boxes = jax.random.uniform(k3, (B, Q, 4), jnp.float32, 0.1, 0.9)

    # Deterministic is_thing_map: even class ids are "things", odd are "stuff".
    is_thing = jnp.asarray([[1 if c % 2 == 0 else 0 for c in range(C)]],
                           dtype=jnp.int32)

    stats, m_id, masks_up = post_process_panoptic(
        pred_logits, pred_masks, pred_boxes, is_thing,
        processed_size=(H, W), threshold=0.85)
    jax.block_until_ready((stats, m_id, masks_up))

    assert stats.shape == (B, Q, 8)
    assert m_id.shape == (B, H, W)
    assert masks_up.shape == (B, Q, H, W)

    scores = stats[..., 0]
    labels = stats[..., 1].astype(jnp.int32)
    keep = stats[..., 2].astype(jnp.int32)
    area = stats[..., 3]
    boxes_xyxy = stats[..., 4:8]

    # ---- reference checks on the f32 paths ----
    probs_ref = jax.nn.softmax(pred_logits, axis=-1)
    scores_ref = jnp.max(probs_ref, axis=-1)
    labels_ref = jnp.argmax(pred_logits, axis=-1).astype(jnp.int32)
    assert jnp.allclose(scores, scores_ref, atol=1e-5)
    assert jnp.array_equal(labels, labels_ref)

    cxr, cyr = pred_boxes[..., 0], pred_boxes[..., 1]
    bwr, bhr = pred_boxes[..., 2], pred_boxes[..., 3]
    boxes_ref = jnp.stack([cxr - 0.5 * bwr, cyr - 0.5 * bhr,
                           cxr + 0.5 * bwr, cyr + 0.5 * bhr], axis=-1)
    assert jnp.allclose(boxes_xyxy, boxes_ref, atol=1e-6)

    # bf16 upsample against f32 reference (loose tolerance for bf16)
    a_h = jnp.asarray(_build_interp_matrix(H, h))
    a_wt = jnp.asarray(_build_interp_matrix(W, w).T)
    up_ref = jnp.einsum("ih,bqhw,wj->bqij", a_h, pred_masks, a_wt)
    assert jnp.allclose(masks_up.astype(jnp.float32), up_ref, atol=0.1, rtol=0.05)

    # Areas over all query ids must tile the whole image; ids stay in range.
    assert int(jnp.sum(area)) == B * H * W
    assert int(jnp.min(m_id)) >= 0 and int(jnp.max(m_id)) < Q
    assert int(jnp.min(keep)) >= 0 and int(jnp.max(keep)) <= 1

    print("KERNEL_OK")
</pallas_src>

<mosaic_0001>
module attributes {stable_mosaic.version = 11 : i64} {
  func.func @kernel(%arg0: i32, %arg1: memref<1x8x16xf32, #tpu.memory_space<vmem>>, %arg2: memref<1x8x16x16xf32, #tpu.memory_space<vmem>>, %arg3: memref<1x8x4xf32, #tpu.memory_space<vmem>>, %arg4: memref<1x16xi32, #tpu.memory_space<vmem>>, %arg5: memref<32x16xf32, #tpu.memory_space<vmem>>, %arg6: memref<16x32xf32, #tpu.memory_space<vmem>>, %arg7: memref<1x8x8xf32, #tpu.memory_space<vmem>>, %arg8: memref<1x32x32xi32, #tpu.memory_space<vmem>>, %arg9: memref<1x8x32x32xbf16, #tpu.memory_space<vmem>>, %arg10: memref<32x32xf32, #tpu.memory_space<vmem>>, %arg11: memref<8x1xf32, #tpu.memory_space<vmem>>, %arg12: memref<8x1xi32, #tpu.memory_space<vmem>>, %arg13: memref<8x16x32xbf16, #tpu.memory_space<vmem>>, %arg14: memref<8x1xf32, #tpu.memory_space<vmem>>) attributes {dimension_semantics = [#tpu.dimension_semantics<parallel>], iteration_bounds = array<i64: 2>, scalar_prefetch = 0 : i64, scratch_operands = 5 : i64, tpu.core_type = #tpu.core_type<tc>, window_params = [{transform_indices = @transform_0, window_bounds = array<i64: 1, 8, 16>}, {transform_indices = @transform_1, window_bounds = array<i64: 1, 8, 16, 16>}, {transform_indices = @transform_2, window_bounds = array<i64: 1, 8, 4>}, {pipeline_mode = #tpu.pipeline_mode<synchronous>, transform_indices = @transform_3, window_bounds = array<i64: 1, 16>}, {pipeline_mode = #tpu.pipeline_mode<synchronous>, transform_indices = @transform_4, window_bounds = array<i64: 32, 16>}, {pipeline_mode = #tpu.pipeline_mode<synchronous>, transform_indices = @transform_5, window_bounds = array<i64: 16, 32>}, {transform_indices = @transform_6, window_bounds = array<i64: 1, 8, 8>}, {transform_indices = @transform_7, window_bounds = array<i64: 1, 32, 32>}, {transform_indices = @transform_8, window_bounds = array<i64: 1, 8, 32, 32>}]} {
    %c0 = arith.constant 0 : index
    %c0_0 = arith.constant 0 : index
    %c0_1 = arith.constant 0 : index
    %0 = vector.load %arg1[%c0, %c0_0, %c0_1] : memref<1x8x16xf32, #tpu.memory_space<vmem>>, vector<1x8x16xf32>
    %1 = vector.shape_cast %0 : vector<1x8x16xf32> to vector<8x16xf32>
    %cst = arith.constant dense<0xFF800000> : vector<8xf32>
    %2 = vector.multi_reduction <maximumf>, %1, %cst [1] : vector<8x16xf32> to vector<8xf32>
    %3 = vector.shape_cast %2 : vector<8xf32> to vector<8x1xf32>
    %4 = vector.broadcast %3 : vector<8x1xf32> to vector<8x16xf32>
    %5 = arith.subf %1, %4 : vector<8x16xf32>
    %6 = math.exp %5 : vector<8x16xf32>
    %cst_2 = arith.constant dense<0.000000e+00> : vector<8xf32>
    %7 = vector.multi_reduction <add>, %6, %cst_2 [1] : vector<8x16xf32> to vector<8xf32>
    %8 = vector.shape_cast %7 : vector<8xf32> to vector<8x1xf32>
    %cst_3 = arith.constant 1.000000e+00 : f32
    %9 = vector.broadcast %cst_3 : f32 to vector<8x1xf32>
    %10 = arith.divf %9, %8 : vector<8x1xf32>
    %11 = tpu.iota {dimensions = array<i32: 1>} : vector<8x16xi32>
    %12 = vector.broadcast %3 : vector<8x1xf32> to vector<8x16xf32>
    %13 = arith.cmpf oeq, %1, %12 : vector<8x16xf32>
    %c16_i32 = arith.constant 16 : i32
    %14 = vector.broadcast %c16_i32 : i32 to vector<8x16xi32>
    %15 = arith.select %13, %11, %14 : vector<8x16xi1>, vector<8x16xi32>
    %cst_4 = arith.constant dense<2147483647> : vector<8xi32>
    %16 = vector.multi_reduction <minsi>, %15, %cst_4 [1] : vector<8x16xi32> to vector<8xi32>
    %17 = vector.shape_cast %16 : vector<8xi32> to vector<8x1xi32>
    %c15_i32 = arith.constant 15 : i32
    %18 = vector.broadcast %c15_i32 : i32 to vector<8x1xi32>
    %19 = arith.cmpi ne, %17, %18 : vector<8x1xi32>
    %cst_5 = arith.constant 8.500000e-01 : f32
    %20 = vector.broadcast %cst_5 : f32 to vector<8x1xf32>
    %21 = arith.cmpf ogt, %10, %20 : vector<8x1xf32>
    %22 = arith.andi %19, %21 : vector<8x1xi1>
    %23 = arith.extui %22 : vector<8x1xi1> to vector<8x1xi32>
    %24 = arith.sitofp %23 : vector<8x1xi32> to vector<8x1xf32>
    %c0_6 = arith.constant 0 : index
    %c0_7 = arith.constant 0 : index
    %c0_8 = arith.constant 0 : index
    %25 = vector.load %arg3[%c0_6, %c0_7, %c0_8] : memref<1x8x4xf32, #tpu.memory_space<vmem>>, vector<1x8x4xf32>
    %26 = vector.shape_cast %25 : vector<1x8x4xf32> to vector<8x4xf32>
    %27 = vector.extract_strided_slice %26 {offsets = [0, 0], sizes = [8, 1], strides = [1, 1]} : vector<8x4xf32> to vector<8x1xf32>
    %28 = vector.extract_strided_slice %26 {offsets = [0, 1], sizes = [8, 1], strides = [1, 1]} : vector<8x4xf32> to vector<8x1xf32>
    %29 = vector.extract_strided_slice %26 {offsets = [0, 2], sizes = [8, 1], strides = [1, 1]} : vector<8x4xf32> to vector<8x1xf32>
    %30 = vector.extract_strided_slice %26 {offsets = [0, 3], sizes = [8, 1], strides = [1, 1]} : vector<8x4xf32> to vector<8x1xf32>
    %cst_9 = arith.constant 5.000000e-01 : f32
    %31 = vector.broadcast %cst_9 : f32 to vector<8x1xf32>
    %32 = arith.mulf %31, %29 : vector<8x1xf32>
    %33 = arith.subf %27, %32 : vector<8x1xf32>
    %cst_10 = arith.constant 5.000000e-01 : f32
    %34 = vector.broadcast %cst_10 : f32 to vector<8x1xf32>
    %35 = arith.mulf %34, %30 : vector<8x1xf32>
    %36 = arith.subf %28, %35 : vector<8x1xf32>
    %cst_11 = arith.constant 5.000000e-01 : f32
    %37 = vector.broadcast %cst_11 : f32 to vector<8x1xf32>
    %38 = arith.mulf %37, %29 : vector<8x1xf32>
    %39 = arith.addf %27, %38 : vector<8x1xf32>
    %cst_12 = arith.constant 5.000000e-01 : f32
    %40 = vector.broadcast %cst_12 : f32 to vector<8x1xf32>
    %41 = arith.mulf %40, %30 : vector<8x1xf32>
    %42 = arith.addf %28, %41 : vector<8x1xf32>
    %43 = vector.broadcast %17 : vector<8x1xi32> to vector<8x16xi32>
    %44 = arith.cmpi eq, %11, %43 : vector<8x16xi32>
    %45 = arith.extui %44 : vector<8x16xi1> to vector<8x16xi32>
    %46 = arith.sitofp %45 : vector<8x16xi32> to vector<8x16xf32>
    %c0_13 = arith.constant 0 : index
    %c0_14 = arith.constant 0 : index
    %47 = vector.load %arg4[%c0_13, %c0_14] : memref<1x16xi32, #tpu.memory_space<vmem>>, vector<1x16xi32>
    %48 = arith.sitofp %47 : vector<1x16xi32> to vector<1x16xf32>
    %cst_15 = arith.constant 1.000000e+00 : f32
    %49 = vector.broadcast %cst_15 : f32 to vector<1x16xf32>
    %50 = arith.subf %49, %48 : vector<1x16xf32>
    %51 = vector.broadcast %50 : vector<1x16xf32> to vector<8x16xf32>
    %52 = arith.mulf %46, %51 : vector<8x16xf32>
    %cst_16 = arith.constant dense<0.000000e+00> : vector<8xf32>
    %53 = vector.multi_reduction <add>, %52, %cst_16 [1] : vector<8x16xf32> to vector<8xf32>
    %54 = vector.shape_cast %53 : vector<8xf32> to vector<8x1xf32>
    %cst_17 = arith.constant 5.000000e-01 : f32
    %55 = vector.broadcast %cst_17 : f32 to vector<8x1xf32>
    %56 = arith.cmpf ogt, %54, %55 : vector<8x1xf32>
    %57 = vector.broadcast %24 : vector<8x1xf32> to vector<8x16xf32>
    %58 = arith.mulf %46, %57 : vector<8x16xf32>
    %cst_18 = arith.constant dense<0.000000e+00> : vector<8x8xf32>
    %59 = tpu.matmul %46, %58, %cst_18 {dimension_numbers = #tpu.dot_dimension_numbers<[1], [1], [0], [0], [0, 0, 1, 0], [], []>} : vector<8x16xf32>, vector<8x16xf32>, vector<8x8xf32> -> vector<8x8xf32>
    %60 = tpu.iota {dimensions = array<i32: 1>} : vector<8x8xi32>
    %cst_19 = arith.constant 5.000000e-01 : f32
    %61 = vector.broadcast %cst_19 : f32 to vector<8x8xf32>
    %62 = arith.cmpf ogt, %59, %61 : vector<8x8xf32>
    %c8_i32 = arith.constant 8 : i32
    %63 = vector.broadcast %c8_i32 : i32 to vector<8x8xi32>
    %64 = arith.select %62, %60, %63 : vector<8x8xi1>, vector<8x8xi32>
    %cst_20 = arith.constant dense<2147483647> : vector<8xi32>
    %65 = vector.multi_reduction <minsi>, %64, %cst_20 [1] : vector<8x8xi32> to vector<8xi32>
    %66 = vector.shape_cast %65 : vector<8xi32> to vector<8x1xi32>
    %67 = tpu.iota {dimensions = array<i32: 0>} : vector<8x1xi32>
    %68 = arith.andi %56, %22 : vector<8x1xi1>
    %69 = arith.select %68, %66, %67 : vector<8x1xi1>, vector<8x1xi32>
    %c0_21 = arith.constant 0 : index
    %c0_22 = arith.constant 0 : index
    %70 = vector.load %arg12[%c0_21, %c0_22] : memref<8x1xi32, #tpu.memory_space<vmem>>, vector<8x1xi32>
    tpu.vector_store %arg12[%c0_21, %c0_22], %69 {strides = array<i32>} : memref<8x1xi32, #tpu.memory_space<vmem>>, vector<8x1xi32>,
    %cst_23 = arith.constant 0.000000e+00 : f32
    %cst_24 = arith.constant -1.000000e+30 : f32
    %71 = vector.broadcast %cst_23 : f32 to vector<8x1xf32>
    %72 = vector.broadcast %cst_24 : f32 to vector<8x1xf32>
    %73 = arith.select %22, %71, %72 : vector<8x1xi1>, vector<8x1xf32>
    %c0_25 = arith.constant 0 : index
    %c0_26 = arith.constant 0 : index
    %74 = vector.load %arg11[%c0_25, %c0_26] : memref<8x1xf32, #tpu.memory_space<vmem>>, vector<8x1xf32>
    tpu.vector_store %arg11[%c0_25, %c0_26], %73 {strides = array<i32>} : memref<8x1xf32, #tpu.memory_space<vmem>>, vector<8x1xf32>,
    %c0_27 = arith.constant 0 : index
    %c0_28 = arith.constant 0 : index
    %c0_29 = arith.constant 0 : index
    %c0_30 = arith.constant 0 : index
    %75 = vector.load %arg2[%c0_27, %c0_28, %c0_29, %c0_30] : memref<1x8x16x16xf32, #tpu.memory_space<vmem>>, vector<1x8x16x16xf32>
    %76 = vector.shape_cast %75 : vector<1x8x16x16xf32> to vector<8x16x16xf32>
    %77 = vector.shape_cast %76 : vector<8x16x16xf32> to vector<128x16xf32>
    %78 = arith.truncf %77 : vector<128x16xf32> to vector<128x16xbf16>
    %c0_31 = arith.constant 0 : index
    %c0_32 = arith.constant 0 : index
    %79 = vector.load %arg6[%c0_31, %c0_32] : memref<16x32xf32, #tpu.memory_space<vmem>>, vector<16x32xf32>
    %80 = arith.truncf %79 : vector<16x32xf32> to vector<16x32xbf16>
    %cst_33 = arith.constant dense<0.000000e+00> : vector<128x32xf32>
    %81 = tpu.matmul %78, %80, %cst_33 {dimension_numbers = #tpu.dot_dimension_numbers<[1], [0], [0], [1], [0, 0, 1, 1], [], []>} : vector<128x16xbf16>, vector<16x32xbf16>, vector<128x32xf32> -> vector<128x32xf32>
    %82 = vector.shape_cast %81 : vector<128x32xf32> to vector<8x16x32xf32>
    %83 = arith.truncf %82 : vector<8x16x32xf32> to vector<8x16x32xbf16>
    %c0_34 = arith.constant 0 : index
    %c0_35 = arith.constant 0 : index
    %c0_36 = arith.constant 0 : index
    %84 = vector.load %arg13[%c0_34, %c0_35, %c0_36] : memref<8x16x32xbf16, #tpu.memory_space<vmem>>, vector<8x16x32xbf16>
    tpu.vector_store %arg13[%c0_34, %c0_35, %c0_36], %83 {strides = array<i32>} : memref<8x16x32xbf16, #tpu.memory_space<vmem>>, vector<8x16x32xbf16>,
    %c0_37 = arith.constant 0 : index
    %c0_38 = arith.constant 0 : index
    %85 = vector.load %arg5[%c0_37, %c0_38] : memref<32x16xf32, #tpu.memory_space<vmem>>, vector<32x16xf32>
    %86 = arith.truncf %85 : vector<32x16xf32> to vector<32x16xbf16>
    %cst_39 = arith.constant -1.000000e+30 : f32
    %87 = vector.broadcast %cst_39 : f32 to vector<32x32xf32>
    %c0_40 = arith.constant 0 : index
    %c0_41 = arith.constant 0 : index
    %88 = vector.load %arg10[%c0_40, %c0_41] : memref<32x32xf32, #tpu.memory_space<vmem>>, vector<32x32xf32>
    tpu.vector_store %arg10[%c0_40, %c0_41], %87 {strides = array<i32>} : memref<32x32xf32, #tpu.memory_space<vmem>>, vector<32x32xf32>,
    %c0_i32 = arith.constant 0 : i32
    %89 = vector.broadcast %c0_i32 : i32 to vector<32x32xi32>
    %c0_42 = arith.constant 0 : index
    %c0_43 = arith.constant 0 : index
    %c0_44 = arith.constant 0 : index
    %90 = vector.load %arg8[%c0_42, %c0_43, %c0_44] : memref<1x32x32xi32, #tpu.memory_space<vmem>>, vector<1x32x32xi32>
    %91 = vector.shape_cast %90 : vector<1x32x32xi32> to vector<32x32xi32>
    %92 = vector.shape_cast %89 : vector<32x32xi32> to vector<1x32x32xi32>
    tpu.vector_store %arg8[%c0_42, %c0_43, %c0_44], %92 {strides = array<i32>} : memref<1x32x32xi32, #tpu.memory_space<vmem>>, vector<1x32x32xi32>,
    %c0_i32_45 = arith.constant 0 : i32
    %c8_i32_46 = arith.constant 8 : i32
    %93 = arith.addi %c0_i32_45, %c8_i32_46 : i32
    %c1_i32 = arith.constant 1 : i32
    scf.for %arg15 = %c0_i32_45 to %93 step %c1_i32  : i32 {
      %c1_i32_57 = arith.constant 1 : i32
      %101 = arith.muli %arg15, %c1_i32_57 : i32
      %c0_i32_58 = arith.constant 0 : i32
      %102 = arith.addi %c0_i32_58, %101 : i32
      %103 = arith.index_cast %102 : i32 to index
      %c0_59 = arith.constant 0 : index
      %c0_60 = arith.constant 0 : index
      %104 = vector.load %arg13[%103, %c0_59, %c0_60] : memref<8x16x32xbf16, #tpu.memory_space<vmem>>, vector<1x16x32xbf16>
      %105 = vector.shape_cast %104 : vector<1x16x32xbf16> to vector<16x32xbf16>
      %cst_61 = arith.constant dense<0.000000e+00> : vector<32x32xf32>
      %106 = tpu.matmul %86, %105, %cst_61 {dimension_numbers = #tpu.dot_dimension_numbers<[1], [0], [0], [1], [0, 0, 1, 1], [], []>} : vector<32x16xbf16>, vector<16x32xbf16>, vector<32x32xf32> -> vector<32x32xf32>
      %107 = vector.shape_cast %106 : vector<32x32xf32> to vector<1x32x32xf32>
      %108 = arith.truncf %107 : vector<1x32x32xf32> to vector<1x32x32xbf16>
      %c0_62 = arith.constant 0 : index
      %109 = arith.index_cast %102 : i32 to index
      %c0_63 = arith.constant 0 : index
      %c0_64 = arith.constant 0 : index
      %110 = vector.load %arg9[%c0_62, %109, %c0_63, %c0_64] : memref<1x8x32x32xbf16, #tpu.memory_space<vmem>>, vector<1x1x32x32xbf16>
      %111 = vector.shape_cast %110 : vector<1x1x32x32xbf16> to vector<1x32x32xbf16>
      %112 = vector.shape_cast %108 : vector<1x32x32xbf16> to vector<1x1x32x32xbf16>
      tpu.vector_store %arg9[%c0_62, %109, %c0_63, %c0_64], %112 {strides = array<i32>} : memref<1x8x32x32xbf16, #tpu.memory_space<vmem>>, vector<1x1x32x32xbf16>,
      %113 = arith.index_cast %102 : i32 to index
      %c0_65 = arith.constant 0 : index
      %114 = vector.load %arg11[%113, %c0_65] : memref<8x1xf32, #tpu.memory_space<vmem>>, vector<1x1xf32>
      %115 = arith.index_cast %102 : i32 to index
      %c0_66 = arith.constant 0 : index
      %116 = vector.load %arg12[%115, %c0_66] : memref<8x1xi32, #tpu.memory_space<vmem>>, vector<1x1xi32>
      %117 = vector.broadcast %114 : vector<1x1xf32> to vector<32x32xf32>
      %118 = arith.addf %106, %117 : vector<32x32xf32>
      %c0_67 = arith.constant 0 : index
      %c0_68 = arith.constant 0 : index
      %119 = vector.load %arg10[%c0_67, %c0_68] : memref<32x32xf32, #tpu.memory_space<vmem>>, vector<32x32xf32>
      %c0_69 = arith.constant 0 : index
      %c0_70 = arith.constant 0 : index
      %c0_71 = arith.constant 0 : index
      %120 = vector.load %arg8[%c0_69, %c0_70, %c0_71] : memref<1x32x32xi32, #tpu.memory_space<vmem>>, vector<1x32x32xi32>
      %121 = vector.shape_cast %120 : vector<1x32x32xi32> to vector<32x32xi32>
      %122 = arith.cmpf ogt, %118, %119 : vector<32x32xf32>
      %123 = vector.shape_cast %116 : vector<1x1xi32> to vector<1x1xi32>
      %124 = vector.broadcast %123 : vector<1x1xi32> to vector<32x32xi32>
      %125 = arith.select %122, %124, %121 : vector<32x32xi1>, vector<32x32xi32>
      %c0_72 = arith.constant 0 : index
      %c0_73 = arith.constant 0 : index
      %c0_74 = arith.constant 0 : index
      %126 = vector.load %arg8[%c0_72, %c0_73, %c0_74] : memref<1x32x32xi32, #tpu.memory_space<vmem>>, vector<1x32x32xi32>
      %127 = vector.shape_cast %126 : vector<1x32x32xi32> to vector<32x32xi32>
      %128 = vector.shape_cast %125 : vector<32x32xi32> to vector<1x32x32xi32>
      tpu.vector_store %arg8[%c0_72, %c0_73, %c0_74], %128 {strides = array<i32>} : memref<1x32x32xi32, #tpu.memory_space<vmem>>, vector<1x32x32xi32>,
      %129 = arith.select %122, %118, %119 : vector<32x32xi1>, vector<32x32xf32>
      %c0_75 = arith.constant 0 : index
      %c0_76 = arith.constant 0 : index
      %130 = vector.load %arg10[%c0_75, %c0_76] : memref<32x32xf32, #tpu.memory_space<vmem>>, vector<32x32xf32>
      tpu.vector_store %arg10[%c0_75, %c0_76], %129 {strides = array<i32>} : memref<32x32xf32, #tpu.memory_space<vmem>>, vector<32x32xf32>,
    }
    %c8_i32_47 = arith.constant 8 : i32
    %c0_i32_48 = arith.constant 0 : i32
    %c8_i32_49 = arith.constant 8 : i32
    %94 = arith.addi %c0_i32_48, %c8_i32_49 : i32
    %c1_i32_50 = arith.constant 1 : i32
    scf.for %arg15 = %c0_i32_48 to %94 step %c1_i32_50  : i32 {
      %c1_i32_57 = arith.constant 1 : i32
      %101 = arith.muli %arg15, %c1_i32_57 : i32
      %c0_i32_58 = arith.constant 0 : i32
      %102 = arith.addi %c0_i32_58, %101 : i32
      %c0_59 = arith.constant 0 : index
      %c0_60 = arith.constant 0 : index
      %c0_61 = arith.constant 0 : index
      %103 = vector.load %arg8[%c0_59, %c0_60, %c0_61] : memref<1x32x32xi32, #tpu.memory_space<vmem>>, vector<1x32x32xi32>
      %104 = vector.shape_cast %103 : vector<1x32x32xi32> to vector<32x32xi32>
      %105 = vector.broadcast %102 : i32 to vector<32x32xi32>
      %106 = arith.cmpi eq, %104, %105 : vector<32x32xi32>
      %107 = arith.extui %106 : vector<32x32xi1> to vector<32x32xi32>
      %108 = arith.sitofp %107 : vector<32x32xi32> to vector<32x32xf32>
      %cst_62 = arith.constant dense<0.000000e+00> : vector<32xf32>
      %109 = vector.multi_reduction <add>, %108, %cst_62 [1] : vector<32x32xf32> to vector<32xf32>
      %110 = vector.shape_cast %109 : vector<32xf32> to vector<32x1xf32>
      %cst_63 = arith.constant dense<0.000000e+00> : vector<1xf32>
      %111 = vector.multi_reduction <add>, %110, %cst_63 [0] : vector<32x1xf32> to vector<1xf32>
      %112 = vector.shape_cast %111 : vector<1xf32> to vector<1x1xf32>
      %113 = arith.index_cast %102 : i32 to index
      %c0_64 = arith.constant 0 : index
      %114 = vector.load %arg14[%113, %c0_64] : memref<8x1xf32, #tpu.memory_space<vmem>>, vector<1x1xf32>
      tpu.vector_store %arg14[%113, %c0_64], %112 {strides = array<i32>} : memref<8x1xf32, #tpu.memory_space<vmem>>, vector<1x1xf32>,
    }
    %c8_i32_51 = arith.constant 8 : i32
    %95 = arith.sitofp %17 : vector<8x1xi32> to vector<8x1xf32>
    %c0_52 = arith.constant 0 : index
    %c0_53 = arith.constant 0 : index
    %96 = vector.load %arg14[%c0_52, %c0_53] : memref<8x1xf32, #tpu.memory_space<vmem>>, vector<8x1xf32>
    %97 = tpu.concatenate %10, %95, %24, %96, %33, %36, %39, %42 in 1 : vector<8x1xf32>, vector<8x1xf32>, vector<8x1xf32>, vector<8x1xf32>, vector<8x1xf32>, vector<8x1xf32>, vector<8x1xf32>, vector<8x1xf32> -> vector<8x8xf32>
    %c0_54 = arith.constant 0 : index
    %c0_55 = arith.constant 0 : index
    %c0_56 = arith.constant 0 : index
    %98 = vector.load %arg7[%c0_54, %c0_55, %c0_56] : memref<1x8x8xf32, #tpu.memory_space<vmem>>, vector<1x8x8xf32>
    %99 = vector.shape_cast %98 : vector<1x8x8xf32> to vector<8x8xf32>
    %100 = vector.shape_cast %97 : vector<8x8xf32> to vector<1x8x8xf32>
    tpu.vector_store %arg7[%c0_54, %c0_55, %c0_56], %100 {strides = array<i32>} : memref<1x8x8xf32, #tpu.memory_space<vmem>>, vector<1x8x8xf32>,
    return
  }
  func.func @transform_0(%arg0: i32) -> (i32, i32, i32) {
    %c0_i32 = arith.constant 0 : i32
    %c0_i32_0 = arith.constant 0 : i32
    %c0_i32_1 = arith.constant 0 : i32
    return %arg0, %c0_i32, %c0_i32_0 : i32, i32, i32
  }
  func.func @transform_1(%arg0: i32) -> (i32, i32, i32, i32) {
    %c0_i32 = arith.constant 0 : i32
    %c0_i32_0 = arith.constant 0 : i32
    %c0_i32_1 = arith.constant 0 : i32
    %c0_i32_2 = arith.constant 0 : i32
    return %arg0, %c0_i32, %c0_i32_0, %c0_i32_1 : i32, i32, i32, i32
  }
  func.func @transform_2(%arg0: i32) -> (i32, i32, i32) {
    %c0_i32 = arith.constant 0 : i32
    %c0_i32_0 = arith.constant 0 : i32
    %c0_i32_1 = arith.constant 0 : i32
    return %arg0, %c0_i32, %c0_i32_0 : i32, i32, i32
  }
  func.func @transform_3(%arg0: i32) -> (i32, i32) {
    %c0_i32 = arith.constant 0 : i32
    %c0_i32_0 = arith.constant 0 : i32
    %c0_i32_1 = arith.constant 0 : i32
    return %c0_i32, %c0_i32_0 : i32, i32
  }
  func.func @transform_4(%arg0: i32) -> (i32, i32) {
    %c0_i32 = arith.constant 0 : i32
    %c0_i32_0 = arith.constant 0 : i32
    %c0_i32_1 = arith.constant 0 : i32
    return %c0_i32, %c0_i32_0 : i32, i32
  }
  func.func @transform_5(%arg0: i32) -> (i32, i32) {
    %c0_i32 = arith.constant 0 : i32
    %c0_i32_0 = arith.constant 0 : i32
    %c0_i32_1 = arith.constant 0 : i32
    return %c0_i32, %c0_i32_0 : i32, i32
  }
  func.func @transform_6(%arg0: i32) -> (i32, i32, i32) {
    %c0_i32 = arith.constant 0 : i32
    %c0_i32_0 = arith.constant 0 : i32
    %c0_i32_1 = arith.constant 0 : i32
    return %arg0, %c0_i32, %c0_i32_0 : i32, i32, i32
  }
  func.func @transform_7(%arg0: i32) -> (i32, i32, i32) {
    %c0_i32 = arith.constant 0 : i32
    %c0_i32_0 = arith.constant 0 : i32
    %c0_i32_1 = arith.constant 0 : i32
    return %arg0, %c0_i32, %c0_i32_0 : i32, i32, i32
  }
  func.func @transform_8(%arg0: i32) -> (i32, i32, i32, i32) {
    %c0_i32 = arith.constant 0 : i32
    %c0_i32_0 = arith.constant 0 : i32
    %c0_i32_1 = arith.constant 0 : i32
    %c0_i32_2 = arith.constant 0 : i32
    return %arg0, %c0_i32, %c0_i32_0, %c0_i32_1 : i32, i32, i32, i32
  }
}

</mosaic_0001>

<bundles_post_ra>
// kernel: tpu_custom_call.1
= control target key start
LH: loop header
LB: loop body
LE: loop exit
PB: predicated region body
PF: predicated region fallthrough
CT: control target
= control target key end

     0   :  { %s2527_s0 = inlined_call_operand.hbm [shape: f32[2,8,16], index: 0, kind: input, shape index: {}]   ;;  %s2528_s1 = inlined_call_operand.hbm [shape: f32[2,8,16,16], index: 1, kind: input, shape index: {}]   ;;  %s2529_s2 = inlined_call_operand.hbm [shape: f32[2,8,4], index: 2, kind: input, shape index: {}]   ;;  %s2530_s3 = inlined_call_operand.hbm [shape: s32[1,16], index: 3, kind: input, shape index: {}]   ;;  %s2531_s4 = inlined_call_operand.hbm [shape: f32[32,16], index: 4, kind: input, shape index: {}]   ;;  %s2532_s5 = inlined_call_operand.hbm [shape: f32[16,32], index: 5, kind: input, shape index: {}]   ;;  %s2533_s6 = inlined_call_operand.hbm [shape: f32[2,8,8], index: 6, kind: output, shape index: {0}]   ;;  %s2534_s7 = inlined_call_operand.hbm [shape: s32[2,32,32], index: 7, kind: output, shape index: {1}]   ;;  %s2535_s8 = inlined_call_operand.hbm [shape: bf16[2,8,32,32], index: 8, kind: output, shape index: {2}]  }
   0x1   :  { %2557 = sst [smem:[#allocation33_spill]] %s2528_s1 }
   0x2   :  { %2558 = sst [smem:[#allocation34_spill]] %s2530_s3 }
   0x3   :  { %2559 = sst [smem:[#allocation35_spill]] %s2533_s6 }
   0x4   :  { %2560 = sst [smem:[#allocation36_spill]] %s2534_s7 }
   0x5   :  { %2561 = sst [smem:[#allocation37_spill]] %s2535_s8 }
   0x6   :  { %14 = vsyncpa [#allocation8], 0 }
   0x7   :  { %16 = vsyncpa [#allocation8 + $0x1], 0 }
   0x8   :  { %17 = vsyncpa [#allocation11], 0 }
   0x9   :  { %19 = vsyncpa [#allocation11 + $0x1], 0 }
   0xa   :  { %20 = vsyncpa [#allocation14], 0 }
   0xb   :  { %21 = vsyncpa [#allocation17], 0 }
   0xc   :  { %22 = vsyncpa [#allocation9], 0 }
   0xd   :  { %24 = vsyncpa [#allocation9 + $0x1], 0 }
   0xe   :  { %25 = vsyncpa [#allocation20], 0 }
   0xf   :  { %27 = vsyncpa [#allocation20 + $0x1], 0  ;;  %s1925_s27 = smov 0   ;;  %s1927_s28 = smov 0  }
  0x10   :  { %s1929_s29 = smov 0   ;;  %s1931_s30 = smov 0  }
  0x11 LB: > { %2562 = sst [smem:[#allocation28_spill]] %s1835_s27  ;;  %s1946_s9 = sadd.s32 4294967295, %s1847_s30   ;;  %s1847_s30 = sphi %s1931_s30, %s2602_s30   ;;  %s1843_s29 = sphi %s1929_s29, %s2604_s29   ;;  %s1839_s28 = sphi %s1927_s28, %s2606_s28   ;;  %s1835_s27 = sphi %s1925_s27, %s2605_s27  }
  0x12   : > { %2563 = sst [smem:[#allocation29_spill]] %s1843_s29  ;;  %s2536_s10 = sadd.s32 4294967294, %s1847_s30  }
  0x13   : > { %s1950_s11 = sadd.s32 1, %s1847_s30   ;;  %s40_s12 = sadd.s32 1, %s1843_s29 }
  0x14   : > { %2564 = sst [smem:[#allocation30_spill]] %s1950_s11  ;;  %s37_s13 = ssub.s32 %s1847_s30, %s1950_s11 }
  0x15   : > { %p47_p0 = scmp.ne.s32.totalorder %s1843_s29, %s1839_s28  ;;  %p38_p1 = scmp.eq.s32.totalorder %s37_s13, 0 }
  0x16   : > { %p48_p2 = scmp.eq.s32.totalorder %s1847_s30, 0  ;;  %p53_p3 = scmp.ne.s32.totalorder %s1839_s28, %s1835_s27 }
  0x17   : > { %p2538_p4 = scmp.eq.s32.totalorder %s1946_s9, 0  ;;  %p192_p7 = scmp.eq.s32.totalorder %s1946_s9, 1 }
  0x18   : > { %s1962_s14 = scalar_select %p38_p1, %s1843_s29, %s40_s12  }
  0x19   : > { %p1964_p5 = por %p48_p2, %p47_p0  ;;  %p1970_p6 = por %p2538_p4, %p53_p3 }
  0x1a   : > { %2565 = sst [smem:[#allocation31_spill]] %s1962_s14  ;;  %p198_p8 = scmp.eq.s32.totalorder %s2536_s10, 1 }
  0x1b   : > { %s2566_s15 = scalar_select %p1964_p5, 1, 0 }
  0x1c   : > { %s2567_s16 = scalar_select %p1970_p6, 1, 0 }
  0x1d   : > { %p1282_p9 = scmp.ge.s32.totalorder %s1847_s30, 1  ;;  %p257_p10 = scmp.lt.s32.totalorder %s1847_s30, 3 }
  0x1e   : > { %p1979_p11 = por %p192_p7, %p47_p0  ;;  %p1983_p12 = por %p198_p8, %p53_p3 }
  0x1f   : > { %p1987_p13 = pnand %p1282_p9, %p257_p10  ;;  %s1857_s20 = smov [#allocation13]  }
  0x20   : > { %s2568_s17 = scalar_select %p1979_p11, 1, 0 }
  0x21   : > { %s2569_s18 = scalar_select %p1983_p12, 1, 0 }
  0x22   : > { %s2571_s19 = scalar_select %p1987_p13, 1, 0 }
  0x23   : > { %2570 = sst [smem:[#allocation32_spill]] %s2569_s18  ;;  %p1420_p2 = pneg %p1987_p13 }
  0x24   : > { %s270_s21 = sshll.u32 %s1857_s20, 4  ;;  %s2002_s23 = sand.u32 1, %s1843_s29   ;;  %s271_s21 = int_to_ptr.vmem [resolvable:$true] %s270_s21 }
  0x25   : > { %p1996_p0 = pnand %p1420_p2, %p2538_p4  ;;  %s325_s24 = sand.u32 1, %s1847_s30  }
  0x26   : > { %s2573_s3 = sld [smem:[#allocation34_spill]] }
  0x27   : > { %s2572_s22 = scalar_select %p1996_p0, 1, 0 }
  0x28   : > { %p2013_p8 = pneg %p1996_p0 }
  0x2a   : > { %s2574_s20 = scalar_select %p2013_p8, 1, 0 }
  0x2c   : > { %s1527_s12 = scalar_lea.hbm %s2573_s3, 16 }
  0x2d   : > { %p1528_p7 = scmp.ne.s32.totalorder %s2573_s3, %s1527_s12  ;;  %p1534_p2 = scmp.lt.u32.totalorder %s1527_s12, %s2573_s3 }
  0x2f   : > { %p1530_p9 = pnand %p2013_p8, %p1528_p7 }
  0x31   : > { %p1531_p10 = pneg %p1530_p9 }
  0x33   : > { %p1536_p1 = pnand %p1534_p2, %p1531_p10 }
  0x35   : > { %1539 = shalt.err (!%p1536_p1)
}
  0x36   : > { %s1540_s25 = scalar_lea.vmem %s271_s21, 16  ;;  %s1547_s10 = scalar_lea.vmem %s271_s21, 32 }
  0x37   : > { %p1541_p4 = scmp.ne.s32.totalorder %s271_s21, %s1540_s25  ;;  %p1548_p11 = scmp.lt.s32.totalorder %s271_s21, %s271_s21 }
  0x38   : > { %p1549_p6 = scmp.lt.s32.totalorder %s1547_s10, %s1540_s25 }
  0x39   : > { %p1543_p3 = pnand %p1541_p4, %p2013_p8 }
  0x3a   : > { %p1550_p13 = por %p1549_p6, %p1548_p11 }
  0x3b   : > { %p1544_p12 = pneg %p1543_p3 }
  0x3d   : > { %p1551_p5 = pnand %p1550_p13, %p1544_p12 }
  0x3f   : > { %1554 = shalt.err (!%p1551_p5)
}
  0x40   : > { %1423 = dma.hbm_to_vmem [thread:$0]  (!%p1996_p0), %s2573_s3, 16, %s271_s21, [#allocation14]  }
  0x41   : > { %p2575_p1 = scmp.ne.s32.totalorder %s2566_s15, 0  ;;  %p2576_p7 = scmp.lt.s32.totalorder %s1847_s30, 2 }
  0x42   : > { %s1289_s14 = sshll.u32 %s2002_s23, 7  ;;  %s1339_s12 = sshll.u32 %s1847_s30, 11 }
  0x43   : > { %p2033_p4 = pnand %p2576_p7, %p2575_p1  ;;  %s2578_s1 = sld [smem:[#allocation33_spill]] }
  0x44   : > { %s329_s26 = scalar_lea.vmem [#allocation10], %s1289_s14  ;;  %s2046_s15 = scalar_lea.sflag [#allocation11], %s325_s24 }
  0x45   : > { %s2577_s29 = scalar_select %p2033_p4, 1, 0 }
  0x46   : > { %s336_s21 = sshll.u32 %s329_s26, 4  ;;  %p2052_p6 = pneg %p2033_p4  ;;  %s2044_s21 = int_to_ptr.vmem [resolvable:$true] %s336_s21 }
  0x48   : > { %s2579_s3 = scalar_select %p2052_p6, 1, 0 }
  0x49   : > { %s2042_s11 = scalar_lea.hbm %s2578_s1, %s1339_s12  ;;  %s1560_s14 = scalar_lea.hbm %s2578_s1, 4096 }
  0x4a   : > { %s1555_s13 = scalar_lea.hbm %s2042_s11, 2048  ;;  %p1561_p13 = scmp.lt.u32.totalorder %s2042_s11, %s2578_s1 }
  0x4b   : > { %p1556_p5 = scmp.ne.s32.totalorder %s2042_s11, %s1555_s13  ;;  %p1562_p3 = scmp.lt.u32.totalorder %s1560_s14, %s1555_s13 }
  0x4c   : > { %p1564_p10 = scmp.lt.u32.totalorder %s1555_s13, %s2042_s11 }
  0x4d   : > { %p1558_p11 = pnand %p2052_p6, %p1556_p5  ;;  %p1563_p9 = por %p1562_p3, %p1561_p13 }
  0x4f   : > { %p1559_p12 = pneg %p1558_p11  ;;  %p1565_p2 = por %p1564_p10, %p1563_p9 }
  0x51   : > { %p1566_p1 = pnand %p1565_p2, %p1559_p12 }
  0x53   : > { %1569 = shalt.err (!%p1566_p1)
}
  0x54   : > { %s1570_s24 = scalar_lea.vmem %s2044_s21, 2048  ;;  %s1858_s12 = smov [#allocation10]  }
  0x55   : > { %p1571_p7 = scmp.ne.s32.totalorder %s2044_s21, %s1570_s24  ;;  %s1575_s25 = sshll.u32 %s1858_s12, 4  ;;  %s1576_s25 = int_to_ptr.vmem [resolvable:$false] %s1575_s25 }
  0x56   : > { %s1577_s10 = scalar_lea.vmem %s1576_s25, 4096  ;;  %p1578_p0 = scmp.lt.s32.totalorder %s2044_s21, %s1576_s25 }
  0x57   : > { %p1573_p5 = pnand %p1571_p7, %p2052_p6  ;;  %p1579_p8 = scmp.lt.s32.totalorder %s1577_s10, %s1570_s24 }
  0x59   : > { %p1574_p11 = pneg %p1573_p5  ;;  %p1580_p13 = por %p1579_p8, %p1578_p0 }
  0x5b   : > { %p1581_p3 = pnand %p1580_p13, %p1574_p11 }
  0x5d   : > { %1584 = shalt.err (!%p1581_p3)
}
  0x5e   : > { %s1859_s13 = smov 128   ;;  %s1860_s14 = smov 8  }
  0x5f   : > { %1436 = dma.hbm_to_vmem [thread:$0]  (!%p2033_p4), %s2042_s11, 2048, %s2044_s21, %s2046_s15, %s1859_s13, %s1859_s13, %s1860_s14  }
  0x60   : > { %s1861_s26 = smov [#allocation15]   ;;  %s1862_s25 = smov [#allocation16]  }
  0x61   : > { %s280_s12 = sshll.u32 %s1861_s26, 4  ;;  %s293_s24 = sshll.u32 %s1862_s25, 4  ;;  %s281_s12 = int_to_ptr.vmem [resolvable:$true] %s280_s12  ;;  %s294_s24 = int_to_ptr.vmem [resolvable:$true] %s293_s24 }
  0x62   : > { %s1585_s18 = scalar_lea.hbm %s2531_s4, 512  ;;  %p2580_p8 = scmp.ne.s32.totalorder %s2574_s20, 0 }
  0x63   : > { %p1586_p0 = scmp.ne.s32.totalorder %s2531_s4, %s1585_s18  ;;  %p1592_p10 = scmp.lt.u32.totalorder %s1585_s18, %s2531_s4 }
  0x65   : > { %p1588_p12 = pnand %p1586_p0, %p2580_p8 }
  0x67   : > { %p1589_p9 = pneg %p1588_p12 }
  0x69   : > { %p1594_p2 = pnand %p1592_p10, %p1589_p9 }
  0x6b   : > { %1597 = shalt.err (!%p1594_p2)
}
  0x6c   : > { %s1598_s11 = scalar_lea.vmem %s281_s12, 512  ;;  %p1606_p11 = scmp.lt.s32.totalorder %s281_s12, %s281_s12 }
  0x6d   : > { %p1599_p1 = scmp.ne.s32.totalorder %s281_s12, %s1598_s11  ;;  %p1607_p13 = scmp.lt.s32.totalorder %s1598_s11, %s1598_s11 }
  0x6f   : > { %p1601_p7 = pnand %p1599_p1, %p2580_p8  ;;  %p1608_p3 = por %p1607_p13, %p1606_p11 }
  0x71   : > { %p1602_p5 = pneg %p1601_p7 }
  0x73   : > { %p1609_p4 = pnand %p1608_p3, %p1602_p5 }
  0x75   : > { %1612 = shalt.err (!%p1609_p4)
}
  0x76   : > { %p2581_p0 = scmp.ne.s32.totalorder %s2572_s22, 0  ;;  %s1613_s27 = scalar_lea.hbm %s2532_s5, 256 }
  0x77   : > { %p1614_p12 = scmp.ne.s32.totalorder %s2532_s5, %s1613_s27  ;;  %p1620_p10 = scmp.lt.u32.totalorder %s1613_s27, %s2532_s5 }
  0x78   : > { %1426 = dma.hbm_to_vmem [thread:$0]  (!%p2581_p0), %s2531_s4, 512, %s281_s12, [#allocation14], %s1859_s13, %s1859_s13, %s1860_s14  }
  0x79   : > { %p1616_p4 = pnand %p1614_p12, %p2580_p8 }
  0x7b   : > { %p1617_p9 = pneg %p1616_p4 }
  0x7d   : > { %p1622_p2 = pnand %p1620_p10, %p1617_p9 }
  0x7f   : > { %1625 = shalt.err (!%p1622_p2)
}
  0x80   : > { %s1626_s10 = scalar_lea.vmem %s294_s24, 256  ;;  %p1634_p11 = scmp.lt.s32.totalorder %s294_s24, %s294_s24 }
  0x81   : > { %p1627_p1 = scmp.ne.s32.totalorder %s294_s24, %s1626_s10  ;;  %p1635_p13 = scmp.lt.s32.totalorder %s1626_s10, %s1626_s10 }
  0x83   : > { %p1629_p7 = pnand %p1627_p1, %p2580_p8  ;;  %p1636_p3 = por %p1635_p13, %p1634_p11 }
  0x85   : > { %p1630_p5 = pneg %p1629_p7 }
  0x87   : > { %p1637_p6 = pnand %p1636_p3, %p1630_p5 }
  0x89   : > { %1640 = shalt.err (!%p1637_p6)
}
  0x8a   : > { %1429 = dma.hbm_to_vmem [thread:$0]  (!%p2581_p0), %s2532_s5, 256, %s294_s24, [#allocation17], %s1859_s13, %s1859_s13, %s1860_s14  }
  0x8b   : > { %s1287_s20 = sshll.u32 %s2002_s23, 3  ;;  %s1288_s1 = sshll.u32 %s1847_s30, 7 }
  0x8c   : > { %s2126_s8 = scalar_lea.hbm %s2527_s0, %s1288_s1  ;;  %s311_s22 = scalar_lea.vmem [#allocation7], %s1287_s20 }
  0x8d   : > { %s318_s27 = sshll.u32 %s311_s22, 4  ;;  %s2135_s13 = scalar_lea.hbm %s2529_s2, %s1288_s1  ;;  %s2130_s27 = int_to_ptr.vmem [resolvable:$true] %s318_s27 }
  0x8e   : > { %s308_s14 = scalar_lea.sflag [#allocation8], %s2002_s23  ;;  %s1641_s24 = scalar_lea.hbm %s2126_s8, 128 }
  0x8f   : > { %p1642_p6 = scmp.ne.s32.totalorder %s2126_s8, %s1641_s24  ;;  %p2582_p8 = scmp.ne.s32.totalorder %s2579_s3, 0 }
  0x90   : > { %s1646_s10 = scalar_lea.hbm %s2527_s0, 256  ;;  %p1647_p4 = scmp.lt.u32.totalorder %s2126_s8, %s2527_s0 }
  0x91   : > { %p1644_p0 = pnand %p1642_p6, %p2582_p8  ;;  %p1648_p9 = scmp.lt.u32.totalorder %s1646_s10, %s1641_s24 }
  0x92   : > { %p1650_p2 = scmp.lt.u32.totalorder %s1641_s24, %s2126_s8 }
  0x93   : > { %p1645_p12 = pneg %p1644_p0  ;;  %p1649_p10 = por %p1648_p9, %p1647_p4 }
  0x95   : > { %p1651_p1 = por %p1650_p2, %p1649_p10 }
  0x97   : > { %p1652_p7 = pnand %p1651_p1, %p1645_p12 }
  0x99   : > { %1655 = shalt.err (!%p1652_p7)
}
  0x9a   : > { %s1656_s1 = scalar_lea.vmem %s2130_s27, 128  ;;  %s1863_s6 = smov [#allocation7]  }
  0x9b   : > { %p1657_p5 = scmp.ne.s32.totalorder %s2130_s27, %s1656_s1  ;;  %s1661_s7 = sshll.u32 %s1863_s6, 4  ;;  %s1662_s7 = int_to_ptr.vmem [resolvable:$false] %s1661_s7 }
  0x9c   : > { %s1663_s22 = scalar_lea.vmem %s1662_s7, 256  ;;  %p1664_p3 = scmp.lt.s32.totalorder %s2130_s27, %s1662_s7 }
  0x9d   : > { %p1659_p11 = pnand %p1657_p5, %p2582_p8  ;;  %p1665_p6 = scmp.lt.s32.totalorder %s1663_s22, %s1656_s1 }
  0x9f   : > { %p1660_p13 = pneg %p1659_p11  ;;  %p1666_p0 = por %p1665_p6, %p1664_p3 }
  0xa1   : > { %p1667_p4 = pnand %p1666_p0, %p1660_p13 }
  0xa3   : > { %1670 = shalt.err (!%p1667_p4)
}
  0xa4   : > { %p2583_p12 = scmp.ne.s32.totalorder %s2577_s29, 0  ;;  %s350_s18 = scalar_lea.vmem [#allocation12], %s1287_s20 }
  0xa5   : > { %s357_s21 = sshll.u32 %s350_s18, 4  ;;  %s1671_s24 = scalar_lea.hbm %s2135_s13, 128  ;;  %s358_s21 = int_to_ptr.vmem [resolvable:$true] %s357_s21 }
  0xa6   : > { %1433 = dma.hbm_to_vmem [thread:$0]  (!%p2583_p12), %s2126_s8, 128, %s2130_s27, %s308_s14  }
  0xa7   : > { %p1672_p9 = scmp.ne.s32.totalorder %s2135_s13, %s1671_s24  ;;  %s1676_s10 = scalar_lea.hbm %s2529_s2, 256 }
  0xa8   : > { %p1677_p1 = scmp.lt.u32.totalorder %s2135_s13, %s2529_s2  ;;  %p1678_p7 = scmp.lt.u32.totalorder %s1676_s10, %s1671_s24 }
  0xa9   : > { %p1674_p10 = pnand %p1672_p9, %p2582_p8  ;;  %p1680_p11 = scmp.lt.u32.totalorder %s1671_s24, %s2135_s13 }
  0xaa   : > { %p1679_p5 = por %p1678_p7, %p1677_p1 }
  0xab   : > { %p1675_p2 = pneg %p1674_p10 }
  0xac   : > { %p1681_p13 = por %p1680_p11, %p1679_p5 }
  0xae   : > { %p1682_p3 = pnand %p1681_p13, %p1675_p2 }
  0xb0   : > { %1685 = shalt.err (!%p1682_p3)
}
  0xb1   : > { %s1686_s23 = scalar_lea.vmem %s358_s21, 128  ;;  %s1864_s20 = smov [#allocation12]  }
  0xb2   : > { %p1687_p6 = scmp.ne.s32.totalorder %s358_s21, %s1686_s23  ;;  %s1691_s8 = sshll.u32 %s1864_s20, 4  ;;  %s1692_s8 = int_to_ptr.vmem [resolvable:$false] %s1691_s8 }
  0xb3   : > { %s1693_s27 = scalar_lea.vmem %s1692_s8, 256  ;;  %p1694_p9 = scmp.lt.s32.totalorder %s358_s21, %s1692_s8 }
  0xb4   : > { %p1689_p0 = pnand %p1687_p6, %p2582_p8  ;;  %p1695_p10 = scmp.lt.s32.totalorder %s1693_s27, %s1686_s23 }
  0xb6   : > { %p1690_p4 = pneg %p1689_p0  ;;  %p1696_p12 = por %p1695_p10, %p1694_p9 }
  0xb8   : > { %p1697_p1 = pnand %p1696_p12, %p1690_p4 }
  0xba   : > { %1700 = shalt.err (!%p1697_p1)
}
  0xbb   : > { %p2584_p7 = scmp.ne.s32.totalorder %s2577_s29, 0  ;;  %p2585_p2 = scmp.ne.s32.totalorder %s2571_s19, 0 }
  0xbc   : > { %s2182_s3 = sand.u32 (!%p2585_p2), 1, %s1839_s28   ;;  %p2586_p8 = scmp.ne.s32.totalorder (!%p2585_p2), %s2567_s16, 0 }
  0xbd   : > { %1439 = dma.hbm_to_vmem [thread:$0]  (!%p2584_p7), %s2135_s13, 128, %s358_s21, %s2046_s15  }
  0xbe   : > { %366 = sbr.rel (%p2585_p2) target bundleno = 1718 (0x6b6), region = 44  ;;  %s2185_s14 = sshll.u32 (!%p2585_p2), %s2182_s3, 3 }
  0xbf   : > { %s369_s1 = scalar_lea.sflag (!%p2585_p2), [#allocation8], %s2182_s3  ;;  %s372_s6 = scalar_lea.vmem (!%p2585_p2), [#allocation7], %s2185_s14 }
  0xc5   : > { %1810 = dma.done.wait (%p2586_p8), %s369_s1, 128  }
  0xc6   : > { %1812 = vsyncadd (%p2586_p8), %s369_s1, 4294967168  ;;  %s377_s19 = sand.u32 1, %s1946_s9   ;;  %s1296_s29 = sshll.u32 %s2182_s3, 7 }
  0xc7   : > { %s378_s15 = scalar_lea.sflag [#allocation11], %s377_s19  ;;  %s2199_s13 = scalar_lea.vmem [#allocation10], %s1296_s29 }
  0xc8   : > { %1814 = dma.done.wait (%p2586_p8), %s378_s15, 2176  }
  0xc9   : > { %1816 = vsyncadd (%p2586_p8), %s378_s15, 4294965120  ;;  %s390_s7 = scalar_lea.vmem [#allocation12], %s2185_s14  ;;  %p2587_p12 = scmp.eq.s32.totalorder %s1946_s9, 0 }
  0xcb   : > { %1818 = dma.done.wait (%p2587_p12), [#allocation14], 528   ;;  %p2588_p5 = pmov %p2587_p12 }
  0xcd   : > { %1820 = vsyncadd (%p2588_p5), [#allocation14], 4294966768  ;;  %p2589_p11 = pmov %p2588_p5 }
  0xce   : > { %p2590_p13 = pmov %p2588_p5 }
  0xcf   : > { %1822 = dma.done.wait (%p2589_p11), [#allocation17], 256  }
  0xd0   : > { %1824 = vsyncadd (%p2590_p13), [#allocation17], 4294967040  ;;  %vm457_vm0 = vcmask 130048   ;;  %v2214_v0 = vld [vmem:[#allocation15] sm:$0xff]  ;;  %v2216_v1 = vld [vmem:[#allocation15 + $0x8] sm:$0xff]  ;;  %v469_v8 = vlaneseq  ;;  %s1302_s16 = sshll.u32 %s2182_s3, 5 }
  0xd1   : > { %v2218_v2 = vld [vmem:[#allocation15 + $0x10] sm:$0xff]  ;;  %v2220_v3 = vld [vmem:[#allocation15 + $0x18] sm:$0xff]  ;;  %v790_v4 = vpack.c.bf16 %v2216_v1, %v2214_v0  ;;  %vm777_vm2 = vcmask 261120   ;;  %v1865_v19 = vmov -1e+30   ;;  %s2238_s22 = scalar_lea.vmem [#allocation19], %s1302_s16 }
  0xd2   : > { %v456_v5 = vld [vmem:[%s372_s6] sm:$0xff]  ;;  %v791_v6 = vpack.c.bf16 %v2220_v3, %v2218_v2  ;;  %v2228_v9 = vand.u32 127, %v469_v8  ;;  %792 = vst.msk [vmem:[#allocation2] sm:$0xff] %vm777_vm2, %v1865_v19  ;;  %793 = vst.msk [vmem:[#allocation2 + $0x8] sm:$0xff] %vm777_vm2, %v1865_v19  ;;  %v1866_v20 = vmov 0   ;;  %v1867_v25 = vmov 0.0  }
  0xd3   : > { %v458_v7 = vsel %vm457_vm0, %v456_v5, -inf  ;;  %794 = vst.msk [vmem:[#allocation2 + $0x10] sm:$0xff] %vm777_vm2, %v1865_v19  ;;  %795 = vst.msk [vmem:[#allocation2 + $0x18] sm:$0xff] %vm777_vm2, %v1865_v19  ;;  %1361 = vmatprep.subr.mxu0 %v1867_v25  ;;  %vm1868_vm4 = vmmov 0   ;;  %vm617_vm6 = vcmask 7168   ;;  %v645_v38 = vld [vmem:[#allocation16] sm:$0xff] }
  0xd4   : > { %459 = vmax.xlane.f32.xlu0 %v458_v7  ;;  %796 = vst.msk [vmem:[%s2238_s22] sm:$0xff] %vm777_vm2, %v1866_v20  ;;  %797 = vst.msk [vmem:[%s2238_s22 + $0x8] sm:$0xff] %vm777_vm2, %v1866_v20  ;;  %1363 = vmatprep.mubr.msk.f32.mxu0 %vm1868_vm4, %v1867_v25  ;;  %v646_v39 = vld [vmem:[#allocation16 + $0x8] sm:$0xff]  ;;  %v626_v42 = vld [vmem:[%s2199_s13 + $0x28] sm:$0xff]  ;;  %vm597_vm10 = vcmask 64512   ;;  %s1869_s18 = smov 126  }
  0xd5   : > { %798 = vst.msk [vmem:[%s2238_s22 + $0x10] sm:$0xff] %vm777_vm2, %v1866_v20  ;;  %799 = vst.msk [vmem:[%s2238_s22 + $0x18] sm:$0xff] %vm777_vm2, %v1866_v20  ;;  %v625_v40 = vld [vmem:[%s2199_s13 + $0x20] sm:$0xff]  ;;  %v647_v41 = vpack.c.bf16 %v646_v39, %v645_v38  ;;  %v627_v43 = vld [vmem:[%s2199_s13 + $0x30] sm:$0xff]  ;;  %s440_s21 = scalar_lea.vmem [#allocation18], %s2185_s14  ;;  %s2329_s24 = scalar_lea.vmem [#allocation21], %s1296_s29 }
  0xd6   : > { %v628_v44 = vld [vmem:[%s2199_s13 + $0x38] sm:$0xff]  ;;  %v639_v45 = vpack.c.bf16 %v626_v42, %v625_v40  ;;  %v629_v46 = vld [vmem:[%s2199_s13 + $0x40] sm:$0xff]  ;;  %v630_v47 = vld [vmem:[%s2199_s13 + $0x48] sm:$0xff]  ;;  %s2331_s26 = smov 0  }
  0xd7   : > { %1390 = vmatprep.subr.bf16.mxu1 %v647_v41  ;;  %v640_v48 = vpack.c.bf16 %v628_v44, %v627_v43  ;;  %v621_v49 = vld [vmem:[%s2199_s13] sm:$0xff]  ;;  %v622_v50 = vld [vmem:[%s2199_s13 + $0x8] sm:$0xff]  ;;  %v641_v51 = vpack.c.bf16 %v630_v47, %v629_v46  ;;  %v623_v53 = vld [vmem:[%s2199_s13 + $0x10] sm:$0xff] }
  0xd8   : > { %1391 = vmatpush3.bf16.msra.mxu1 %v647_v41  ;;  %1372 = vmatprep.mubr.msk.bf16.mxu1 %vm457_vm0, %v639_v45  ;;  %v637_v52 = vpack.c.bf16 %v622_v50, %v621_v49  ;;  %v624_v54 = vld [vmem:[%s2199_s13 + $0x18] sm:$0xff]  ;;  %v631_v56 = vld [vmem:[%s2199_s13 + $0x50] sm:$0xff]  ;;  %v633_v58 = vld [vmem:[%s2199_s13 + $0x60] sm:$0xff] }
  0xd9   : > { %v638_v55 = vpack.c.bf16 %v624_v54, %v623_v53  ;;  %v632_v57 = vld [vmem:[%s2199_s13 + $0x58] sm:$0xff]  ;;  %v634_v59 = vld [vmem:[%s2199_s13 + $0x68] sm:$0xff]  ;;  %v635_v62 = vld [vmem:[%s2199_s13 + $0x70] sm:$0xff] }
  0xda   : > { %v642_v60 = vpack.c.bf16 %v632_v57, %v631_v56  ;;  %v643_v61 = vpack.c.bf16 %v634_v59, %v633_v58  ;;  %v636_v63 = vld [vmem:[%s2199_s13 + $0x78] sm:$0xff]  ;;  %v504_v7 = vld [vmem:[#allocation13] sm:$0x1] }
  0xdb   : > { %1373 = vmatmul.mubr.msk.bf16.vlgmr.msra.gmra.mrb[0].mxu1 %vm457_vm0, %v640_v48 }
  0xdc   : > { %1376 = vmatprep.mubr.msk.bf16.mxu1 %vm457_vm0, %v641_v51  ;;  %v2310_v51 = vld [vmem:[%s390_s7] sm:$0xff] }
  0xe3   : > { %1377 = vmatmul.mubr.msk.bf16.gmra.mrb[4].mxu1 %vm457_vm0, %v642_v60 }
  0xe4   : > { %1380 = vmatprep.mubr.msk.bf16.mxu1 %vm457_vm0, %v643_v61 }
 0x161   : > { %v460_v10 = vpop.xlane.xlu0 %459 }
 0x162   : > { %v461_v11 = vsub.f32 %v456_v5, %v460_v10  ;;  %vm471_vm1 = vcmp.eq.f32.partialorder %v456_v5, %v460_v10  ;;  %v644_v5 = vpack.c.bf16 %v636_v63, %v635_v62  ;;  %v505_v10 = vcvt.s32.f32 %v504_v7 }
 0x163   : > { %v472_v12 = vsel %vm471_vm1, %v2228_v9, 16 }
 0x164   : > { %v462_v13 = vmul.f32 1.442695, %v461_v11  ;;  %v473_v14 = vsel %vm457_vm0, %v472_v12, 2147483647  ;;  %1381 = vmatmul.mubr.msk.bf16.gmra.mrb[8].mxu1 %vm457_vm0, %v644_v5  ;;  %v2295_v11 = vshrl.u32 %v469_v8, 7  ;;  %v506_v12 = vsub.f32 1.0, %v505_v10 }
 0x165   : > { %v475_v15 = vshra.s32 %v473_v14, 16  ;;  %v474_v21 = vand.u32 65535, %v473_v14 }
 0x166   : > { %1523 = vpow2.f32 %v462_v13  ;;  %v510_v13 = vsub.s32 0, %v2295_v11 }
 0x167   : > { %v477_v16 = vcvt.s32.f32 %v475_v15  ;;  %v476_v23 = vcvt.s32.f32 %v474_v21 }
 0x169   : > { %478 = vmin.xlane.f32.xlu0 %v477_v16 }
 0x170   : > { %v1524_v17 = vpop.eup %1523 }
 0x171   : > { %v464_v18 = vsel %vm457_vm0, %v1524_v17, 0.0 }
 0x172   : > { %465 = vadd.xlane.f32.xlu1 %v464_v18  ;;  %v511_v18 = vrot.slane %v506_v12, %v510_v13 }
 0x1ae   : > { %v1374_v8 = vpop.f32.mrb[0].mxu1 }
 0x1f6   : > { %v479_v22 = vpop.xlane.xlu0 %478 }
 0x1f7   : > { %vm480_vm3 = vcmp.eq.f32.partialorder %v477_v16, %v479_v22  ;;  %v485_v27 = vcvt.f32.s32 %v479_v22 }
 0x1f8   : > { %v481_v24 = vsel %vm480_vm3, %v476_v23, inf  ;;  %v722_v23 = vpop.f32.mrb[1].mxu1 }
 0x1f9   : > { %482 = vmin.xlane.f32.xlu1 %v481_v24  ;;  %v486_v29 = vshll.u32 %v485_v27, 16 }
 0x1ff   : > { %v466_v26 = vpop.xlane.xlu1 %465 }
 0x200   : > { %1525 = vrcp.f32 %v466_v26 }
 0x20a   : > { %v2248_v31 = vpop.eup %1525 }
 0x20b   : > { %vm489_vm5 = vcmp.gt.f32.partialorder %v2248_v31, 0.85 }
 0x286   : > { %v483_v28 = vpop.xlane.xlu1 %482 }
 0x287   : > { %v484_v30 = vcvt.f32.s32 %v483_v28 }
 0x289   : > { %v2250_v32 = vadd.s32 %v486_v29, %v484_v30 }
 0x28b   : > { %vm488_vm7 = vcmp.ne.s32.totalorder %v2250_v32, 15  ;;  %vm501_vm8 = vcmp.eq.s32.totalorder %v2228_v9, %v2250_v32 }
 0x28c   : > { %vm2256_vm9 = vmand %vm488_vm7, %vm489_vm5  ;;  %v1305_v34 = vsel %vm501_vm8, 1.0, %v1867_v25 }
 0x28d   : > { %v619_v35 = vsel %vm2256_vm9, 0.0, %v1865_v19  ;;  %v2264_v36 = vsel %vm2256_vm9, 1.0, %v1867_v25  ;;  %v513_v21 = vmul.f32 %v1305_v34, %v511_v18  ;;  %v1375_v25 = vpop.f32.mrb[2].mxu1 }
 0x28e   : > { %620 = vst.msk [vmem:[#allocation3] sm:$0xff] %vm617_vm6, %v619_v35  ;;  %v518_v37 = vmul.f32 %v1305_v34, %v2264_v36  ;;  %v772_v27 = vpack.c.bf16 %v1375_v25, %v1374_v8  ;;  %v725_v28 = vpop.f32.mrb[3].mxu1 }
 0x28f   : > { %v514_v22 = vsel %vm457_vm0, %v513_v21, 0.0  ;;  %v771_v30 = vpack.c.bf16 %v725_v28, %v722_v23 }
 0x290   : > { %1362 = vmatpush3.xpose.msk.msra.mxu0 %vm457_vm0, %v518_v37  ;;  %781 = vst.msk [vmem:[#allocation5 + $0x18] sm:$0xff] %vm777_vm2, %v772_v27 }
 0x291   : > { %1366 = vmatprep.subr.bf16.mxu0 %v647_v41  ;;  %780 = vst.msk [vmem:[#allocation5 + $0x10] sm:$0xff] %vm777_vm2, %v771_v30 }
 0x293   : > { %1364 = vmatmul.mubr.msk.f32.vlgmr.msra.gmra.mrb[0].mxu0 %vm457_vm0, %v1305_v34  ;;  %v1378_v34 = vpop.f32.mrb[4].mxu1 }
 0x294   : > { %1367 = vmatpush3.bf16.msra.mxu0 %v647_v41  ;;  %1368 = vmatprep.mubr.msk.bf16.mxu0 %vm457_vm0, %v637_v52  ;;  %v738_v35 = vpop.f32.mrb[5].mxu1  ;;  %v494_v52 = vmul.f32 0.5, %v2310_v51 }
 0x295   : > { %v1379_v37 = vpop.f32.mrb[6].mxu1 }
 0x296   : > { %v774_v38 = vpack.c.bf16 %v1379_v37, %v1378_v34  ;;  %v741_v39 = vpop.f32.mrb[7].mxu1 }
 0x297   : > { %1369 = vmatmul.mubr.msk.bf16.vlgmr.msra.gmra.mrb[4].mxu0 %vm457_vm0, %v638_v55  ;;  %v773_v40 = vpack.c.bf16 %v741_v39, %v738_v35  ;;  %v1382_v41 = vpop.f32.mrb[8].mxu1 }
 0x298   : > { %783 = vst.msk [vmem:[#allocation5 + $0x28] sm:$0xff] %vm777_vm2, %v774_v38  ;;  %v754_v42 = vpop.f32.mrb[9].mxu1 }
 0x299   : > { %782 = vst.msk [vmem:[#allocation5 + $0x20] sm:$0xff] %vm777_vm2, %v773_v40  ;;  %v1383_v43 = vpop.f32.mrb[10].mxu1 }
 0x29a   : > { %v776_v44 = vpack.c.bf16 %v1383_v43, %v1382_v41  ;;  %v757_v45 = vpop.f32.mrb[11].mxu1 }
 0x29b   : > { %v775_v46 = vpack.c.bf16 %v757_v45, %v754_v42 }
 0x29c   : > { %785 = vst.msk [vmem:[#allocation5 + $0x38] sm:$0xff] %vm777_vm2, %v776_v44 }
 0x29d   : > { %784 = vst.msk [vmem:[#allocation5 + $0x30] sm:$0xff] %vm777_vm2, %v775_v46 }
 0x366   : > { %v591_v14 = vpop.f32.mrb[0].mxu0 }
 0x367   : > { %vm595_vm11 = vcmp.gt.f32.partialorder %v591_v14, 0.5  ;;  %v1365_v15 = vpop.f32.mrb[1].mxu0 }
 0x368   : > { %v596_v16 = vsel %vm595_vm11, %v2228_v9, 8 }
 0x369   : > { %v598_v17 = vsel %vm597_vm10, %v596_v16, 2147483647 }
 0x36a   : > { %v600_v19 = vshra.s32 %v598_v17, 16  ;;  %v1370_v24 = vpop.f32.mrb[4].mxu0  ;;  %v599_v47 = vand.u32 65535, %v598_v17 }
 0x36b   : > { %v706_v26 = vpop.f32.mrb[5].mxu0 }
 0x36c   : > { %v602_v20 = vcvt.s32.f32 %v600_v19  ;;  %v1371_v29 = vpop.f32.mrb[6].mxu0  ;;  %v601_v49 = vcvt.s32.f32 %v599_v47 }
 0x36d   : > { %v770_v9 = vpack.c.bf16 %v1371_v29, %v1370_v24  ;;  %v709_v53 = vpop.f32.mrb[7].mxu0 }
 0x36e   : > { %603 = vmin.xlane.f32.xlu0 %v602_v20  ;;  %v769_v54 = vpack.c.bf16 %v709_v53, %v706_v26 }
 0x36f   : > { %779 = vst.msk [vmem:[#allocation5 + $0x8] sm:$0xff] %vm777_vm2, %v770_v9 }
 0x370   : > { %778 = vst.msk [vmem:[#allocation5] sm:$0xff] %vm777_vm2, %v769_v54 }
 0x372   : > { %515 = vadd.xlane.f32.xlu0 %v514_v22 }
 0x3fb   : > { %v604_v48 = vpop.xlane.xlu0 %603 }
 0x3fc   : > { %vm605_vm12 = vcmp.eq.f32.partialorder %v602_v20, %v604_v48  ;;  %v610_v55 = vcvt.f32.s32 %v604_v48 }
 0x3fd   : > { %v606_v50 = vsel %vm605_vm12, %v601_v49, inf }
 0x3fe   : > { %607 = vmin.xlane.f32.xlu1 %v606_v50  ;;  %v611_v58 = vshll.u32 %v610_v55, 16 }
 0x3ff   : > { %v516_v56 = vpop.xlane.xlu0 %515 }
 0x400   : > { %vm517_vm13 = vcmp.gt.f32.partialorder %v516_v56, 0.5 }
 0x401   : > { %vm615_vm14 = vmand %vm517_vm13, %vm2256_vm9 }
 0x40f   : > { %496 = vrot.lane.b32.xlu1 %v494_v52, %s1869_s18 }
 0x48b   : > { %v608_v57 = vpop.xlane.xlu1 %607 }
 0x48c   : > { %v609_v59 = vcvt.f32.s32 %v608_v57 }
 0x48e   : > { %v612_v60 = vadd.s32 %v611_v58, %v609_v59 }
 0x48f   : > { %v2316_v61 = vpop.permute.xlu1 %496 }
 0x490   : > { %v616_v62 = vsel %vm615_vm14, %v612_v60, %v2295_v11  ;;  %v499_v63 = vsub.f32 %v2310_v51, %v2316_v61  ;;  %v2323_v5 = vadd.f32 %v2316_v61, %v2310_v51 }
 0x491   : > { %618 = vst.msk [vmem:[#allocation4] sm:$0xff] %vm617_vm6, %v616_v62 }
 0x492 LB: >> { %1386 = vmatprep.mubr.msk.bf16.mxu0 %vm457_vm0, %v790_v4  ;;  %s1316_s25 = sshll.u32 %s1851_s26, 3  ;;  %s888_s12 = scalar_lea.vmem [#allocation3], %s1851_s26  ;;  %vm883_vm15 = vcmask 257024   ;;  %v902_v13 = vld [vmem:[#allocation2 + $0x10] sm:$0xff]  ;;  %v900_v17 = vld [vmem:[#allocation2] sm:$0xff]  ;;  %v903_v8 = vld [vmem:[#allocation2 + $0x18] sm:$0xff]  ;;  %s1851_s26 = sphi %s2331_s26, %s805_s26  }
 0x493   : >> { %s807_s10 = scalar_lea.vmem [#allocation5], %s1316_s25  ;;  %v889_v7 = vld [vmem:[%s888_s12] sm:$0x1]  ;;  %s890_s11 = scalar_lea.vmem [#allocation4], %s1851_s26  ;;  %v906_v18 = vld [vmem:[%s2238_s22 + $0x10] sm:$0xff]  ;;  %v907_v26 = vld [vmem:[%s2238_s22 + $0x18] sm:$0xff] }
 0x494   : >> { %v808_v33 = vld [vmem:[%s807_s10] sm:$0xff]  ;;  %1392 = vpush %v889_v7  ;;  %s1344_s20 = sshll.u32 %s1851_s26, 4  ;;  %v901_v9 = vld [vmem:[#allocation2 + $0x8] sm:$0xff]  ;;  %s805_s26 = sadd.s32 1, %s1851_s26  }
 0x495   : >> { %1384 = vmatprep.subr.bf16.mxu0 %v808_v33  ;;  %s2349_s27 = scalar_lea.vmem %s2329_s24, %s1344_s20 [#allocation21]  ;;  %v904_v23 = vld [vmem:[%s2238_s22] sm:$0xff]  ;;  %v905_v38 = vld [vmem:[%s2238_s22 + $0x8] sm:$0xff]  ;;  %p802_p3 = scmp.ge.s32.totalorder %s805_s26, 8  }
 0x496   : >> { %1385 = vmatpush3.bf16.msra.mxu0 %v808_v33  ;;  %s2378_s1 = smov (%p802_p3), 0  }
 0x498   : >> { %v891_v10 = vld [vmem:[%s890_s11] sm:$0x1] }
 0x499   : >> { %1394 = vpush %v891_v10  ;;  %1387 = vmatmul.mubr.msk.bf16.vlgmr.msra.gmra.mrb[0].mxu0 %vm457_vm0, %v791_v6 }
 0x4c5   : >> { %s1393_s23 = spop %1392 }
 0x4c6   : >> { %v894_v11 = vstv %s1393_s23 }
 0x4ca   : >> { %s1395_s8 = spop %1394 }
 0x4cb   : >> { %v913_v19 = vstv %s1395_s8 }
 0x56c   : >> { %v1388_v12 = vpop.f32.mrb[0].mxu0 }
 0x56d   : >> { %v1342_v14 = vpack.c.bf16 %v1388_v12, %v1388_v12  ;;  %v898_v15 = vadd.f32 %v1388_v12, %v894_v11  ;;  %v849_v16 = vpop.f32.mrb[1].mxu0 }
 0x56e   : >> { %v1340_v20 = vpack.c.bf16 %v849_v16, %v849_v16  ;;  %v896_v21 = vadd.f32 %v894_v11, %v849_v16  ;;  %v1389_v22 = vpop.f32.mrb[2].mxu0 }
 0x56f   : >> { %886 = vst.msk [vmem:[%s2349_s27 + $0x8] sm:$0xf] %vm883_vm15, %v1342_v14  ;;  %vm910_vm1 = vcmp.gt.f32.partialorder %v898_v15, %v902_v13  ;;  %v1343_v24 = vpack.c.bf16 %v1389_v22, %v1389_v22  ;;  %v899_v25 = vadd.f32 %v1389_v22, %v894_v11  ;;  %v852_v27 = vpop.f32.mrb[3].mxu0 }
 0x570   : >> { %v924_v28 = vsel %vm910_vm1, %v898_v15, %v902_v13  ;;  %884 = vst.msk [vmem:[%s2349_s27] sm:$0xf] %vm883_vm15, %v1340_v20  ;;  %vm908_vm3 = vcmp.gt.f32.partialorder %v896_v21, %v900_v17  ;;  %v916_v29 = vsel %vm910_vm1, %v913_v19, %v906_v18  ;;  %v1341_v30 = vpack.c.bf16 %v852_v27, %v852_v27 }
 0x571   : >> { %928 = vst.msk [vmem:[#allocation2 + $0x10] sm:$0xff] %vm777_vm2, %v924_v28  ;;  %v922_v34 = vsel %vm908_vm3, %v896_v21, %v900_v17  ;;  %vm911_vm4 = vcmp.gt.f32.partialorder %v899_v25, %v903_v8  ;;  %v914_v35 = vsel %vm908_vm3, %v913_v19, %v904_v23  ;;  %920 = vst.msk [vmem:[%s2238_s22 + $0x10] sm:$0xff] %vm777_vm2, %v916_v29 }
 0x572   : >> { %887 = vst.msk [vmem:[%s2349_s27 + $0xc] sm:$0xf] %vm883_vm15, %v1343_v24  ;;  %v897_v37 = vadd.f32 %v894_v11, %v852_v27  ;;  %v925_v39 = vsel %vm911_vm4, %v899_v25, %v903_v8  ;;  %v917_v40 = vsel %vm911_vm4, %v913_v19, %v907_v26  ;;  %885 = vst.msk [vmem:[%s2349_s27 + $0x4] sm:$0xf] %vm883_vm15, %v1341_v30 }
 0x573   : >> { %926 = vst.msk [vmem:[#allocation2] sm:$0xff] %vm777_vm2, %v922_v34  ;;  %918 = vst.msk [vmem:[%s2238_s22] sm:$0xff] %vm777_vm2, %v914_v35 }
 0x574   : >> { %929 = vst.msk [vmem:[#allocation2 + $0x18] sm:$0xff] %vm777_vm2, %v925_v39  ;;  %921 = vst.msk [vmem:[%s2238_s22 + $0x18] sm:$0xff] %vm777_vm2, %v917_v40  ;;  %vm909_vm5 = vcmp.gt.f32.partialorder %v897_v37, %v901_v9 }
 0x575   : >> { %v915_v41 = vsel %vm909_vm5, %v913_v19, %v905_v38  ;;  %v923_v42 = vsel %vm909_vm5, %v897_v37, %v901_v9 }
 0x576   : >> { %919 = vst.msk [vmem:[%s2238_s22 + $0x8] sm:$0xff] %vm777_vm2, %v915_v41  ;;  %927 = vst.msk [vmem:[#allocation2 + $0x8] sm:$0xff] %vm777_vm2, %v923_v42  ;;  %804 = sbr.rel (!%p802_p3) target bundleno = 1170 (0x492), region = 176 }
 0x57d LB: >> { %v936_v43 = vld [vmem:[%s2238_s22] sm:$0xff]  ;;  %v938_v44 = vld [vmem:[%s2238_s22 + $0x10] sm:$0xff]  ;;  %v937_v45 = vld [vmem:[%s2238_s22 + $0x8] sm:$0xff]  ;;  %v940_v47 = vstv %s1855_s1  ;;  %v1870_v0 = vmov 0.0   ;;  %vm975_vm11 = vcmask 0   ;;  %s974_s6 = scalar_lea.vmem [#allocation6], %s1855_s1  ;;  %s1855_s1 = sphi %s2378_s1, %s935_s1  }
 0x57e   : >> { %v939_v46 = vld [vmem:[%s2238_s22 + $0x18] sm:$0xff]  ;;  %vm941_vm7 = vcmp.eq.s32.totalorder %v936_v43, %v940_v47  ;;  %vm943_vm8 = vcmp.eq.s32.totalorder %v938_v44, %v940_v47  ;;  %vm942_vm9 = vcmp.eq.s32.totalorder %v937_v45, %v940_v47  ;;  %s935_s1 = sadd.s32 1, %s1855_s1  }
 0x57f   : >> { %vm944_vm0 = vcmp.eq.s32.totalorder %v939_v46, %v940_v47  ;;  %v1325_v1 = vsel %vm941_vm7, 1.0, %v1870_v0  ;;  %v1327_v2 = vsel %vm943_vm8, 1.0, %v1870_v0  ;;  %v1326_v3 = vsel %vm942_vm9, 1.0, %v1870_v0  ;;  %p932_p6 = scmp.ge.s32.totalorder %s935_s1, 8  }
 0x580   : >> { %v1328_v4 = vsel %vm944_vm0, 1.0, %v1870_v0  ;;  %v953_v6 = vsel %vm777_vm2, %v1325_v1, 0.0  ;;  %v959_v48 = vsel %vm777_vm2, %v1327_v2, 0.0  ;;  %v956_v49 = vsel %vm777_vm2, %v1326_v3, 0.0  ;;  %s1871_s29 = smov (%p932_p6), 3   ;;  %s1872_s15 = smov (%p932_p6), 6  }
 0x581   : >> { %954 = vadd.xlane.f32.xlu0 %v953_v6  ;;  %960 = vadd.xlane.f32.xlu1 %v959_v48  ;;  %v962_v50 = vsel %vm777_vm2, %v1328_v4, 0.0  ;;  %s1345_s13 = sshll.u32 (%p932_p6), %s1946_s9, 9  ;;  %s1042_s7 = sshll.u32 (%p932_p6), %s2238_s22, 4  ;;  %s2404_s7 = int_to_ptr.vmem [resolvable:$true] %s1042_s7 }
 0x582   : > { %s2593_s26 = sld [smem:[#allocation36_spill]] (%p932_p6)  ;;  %s1873_s10 = smov (%p932_p6), 4  }
 0x583   : > { %s2412_s12 = scalar_lea.sflag (%p932_p6), [#allocation20], %s377_s19  ;;  %s1701_s22 = scalar_lea.vmem (%p932_p6), %s2404_s7, 512 }
 0x584   : > { %p1702_p0 = scmp.ne.s32.totalorder (%p932_p6), %s2404_s7, %s1701_s22  ;;  %p2594_p4 = scmp.ne.s32.totalorder (%p932_p6), %s2568_s17, 0 }
 0x585   : >> { %957 = vadd.xlane.f32.xlu0 %v956_v49  ;;  %963 = vadd.xlane.f32.xlu1 %v962_v50  ;;  %s1874_s11 = smov (%p932_p6), [#allocation19]  }
 0x586   : > { %p1703_p9 = pnand (%p932_p6), %p1702_p0, %p2594_p4  ;;  %s1705_s23 = sshll.u32 (%p932_p6), %s1874_s11, 4  ;;  %s1706_s23 = int_to_ptr.vmem [resolvable:$false] %s1705_s23 }
 0x587   : > { %s1707_s20 = scalar_lea.vmem (%p932_p6), %s1706_s23, 1024  ;;  %p1708_p1 = scmp.lt.s32.totalorder (%p932_p6), %s2404_s7, %s1706_s23 }
 0x588   : > { %s2402_s25 = scalar_lea.hbm (%p932_p6), %s2593_s26, %s1345_s13  ;;  %p1704_p10 = pneg (%p932_p6), %p1703_p9 }
 0x589   : > { %p1709_p7 = scmp.lt.s32.totalorder (%p932_p6), %s1707_s20, %s1701_s22 }
 0x58b   : > { %p1710_p2 = por (%p932_p6), %p1709_p7, %p1708_p1 }
 0x58d   : > { %p1711_p8 = pnand (%p932_p6), %p1710_p2, %p1704_p10 }
 0x596   : > { %988 = vrot.lane.b32.xlu1 (%p932_p6), %v2323_v5, %s1872_s15 }
 0x60e   : >> { %v955_v52 = vpop.xlane.xlu0 %954  ;;  %v961_v53 = vpop.xlane.xlu1 %960 }
 0x612   : >> { %v958_v54 = vpop.xlane.xlu0 %957  ;;  %v964_v56 = vpop.xlane.xlu1 %963 }
 0x613   : >> { %v965_v55 = vadd.f32 %v958_v54, %v955_v52 }
 0x615   : >> { %v966_v57 = vadd.f32 %v965_v55, %v961_v53 }
 0x617   : >> { %v967_v58 = vadd.f32 %v966_v57, %v964_v56 }
 0x619   : >> { %v968_v59 = vrot.slane %v967_v58, 4 }
 0x61b   : >> { %v969_v60 = vadd.f32 %v968_v59, %v967_v58 }
 0x61d   : >> { %v970_v62 = vrot.slane %v969_v60, 2 }
 0x61f   : >> { %v971_v33 = vadd.f32 %v970_v62, %v969_v60  ;;  %934 = sbr.rel (!%p932_p6) target bundleno = 1405 (0x57d), region = 187 }
 0x621   : >> { %v972_v7 = vrot.slane %v971_v33, 1 }
 0x623   : >> { %v973_v10 = vadd.f32 %v972_v7, %v971_v33 }
 0x625   : >> { %976 = vst.msk [vmem:[%s974_s6] sm:$0x1] %vm975_vm11, %v973_v10 }
 0x62c   : > { %v978_v11 = vld [vmem:[#allocation6] sm:$0xff] }
 0x62d   : > { %980 = vrot.lane.b32.xlu0 %v978_v11, %s1871_s29 }
 0x631   : > { %984 = vrot.lane.b32.xlu0 %v499_v63, %s1873_s10 }
 0x632   : > { %1714 = shalt.err (!%p1711_p8)
}
 0x633   : > { %s1715_s19 = scalar_lea.hbm %s2402_s25, 512  ;;  %s1719_s1 = scalar_lea.hbm %s2593_s26, 1024 }
 0x634   : > { %p1716_p12 = scmp.ne.s32.totalorder %s2402_s25, %s1715_s19  ;;  %p1720_p13 = scmp.lt.u32.totalorder %s2402_s25, %s2593_s26 }
 0x635   : > { %p1721_p3 = scmp.lt.u32.totalorder %s1719_s1, %s1715_s19  ;;  %p1723_p0 = scmp.lt.u32.totalorder %s1715_s19, %s2402_s25 }
 0x636   : > { %p1717_p5 = pnand %p1716_p12, %p2594_p4 }
 0x637   : > { %p1722_p6 = por %p1721_p3, %p1720_p13 }
 0x638   : > { %p1718_p11 = pneg %p1717_p5 }
 0x639   : > { %p1724_p9 = por %p1723_p0, %p1722_p6 }
 0x63b   : > { %p1725_p10 = pnand %p1724_p9, %p1718_p11 }
 0x63d   : > { %1728 = shalt.err (!%p1725_p10)
}
 0x63e   : > { %s1875_s15 = smov 128   ;;  %s1876_s13 = smov 8  }
 0x63f   : > { %1415 = dma.vmem_to_hbm [thread:$0]  (%p2594_p4), %s2404_s7, 512, %s2402_s25, %s2412_s12, %s1875_s15, %s1875_s15, %s1876_s13  }
 0x640   : > { %s1346_s16 = sshll.u32 %s1946_s9, 11  ;;  %s2595_s11 = sld [smem:[#allocation37_spill]] }
 0x641   : > { %s1058_s20 = sshll.u32 %s2329_s24, 4  ;;  %s1877_s8 = smov [#allocation21]   ;;  %s2443_s20 = int_to_ptr.vmem [resolvable:$true] %s1058_s20 }
 0x642   : > { %s1729_s19 = scalar_lea.vmem %s2443_s20, 2048  ;;  %s1733_s27 = sshll.u32 %s1877_s8, 4  ;;  %s1734_s27 = int_to_ptr.vmem [resolvable:$false] %s1733_s27 }
 0x643   : > { %p1730_p1 = scmp.ne.s32.totalorder %s2443_s20, %s1729_s19  ;;  %s1735_s7 = scalar_lea.vmem %s1734_s27, 4096 }
 0x644   : > { %p1736_p8 = scmp.lt.s32.totalorder %s2443_s20, %s1734_s27  ;;  %p1737_p12 = scmp.lt.s32.totalorder %s1735_s7, %s1729_s19 }
 0x645   : > { %p1731_p7 = pnand %p1730_p1, %p2594_p4 }
 0x646   : > { %s2440_s23 = scalar_lea.hbm %s2595_s11, %s1346_s16  ;;  %p1738_p5 = por %p1737_p12, %p1736_p8 }
 0x647   : > { %p1732_p2 = pneg %p1731_p7 }
 0x649   : > { %p1739_p11 = pnand %p1738_p5, %p1732_p2 }
 0x64b   : > { %1742 = shalt.err (!%p1739_p11)
}
 0x64c   : > { %s1743_s24 = scalar_lea.hbm %s2440_s23, 2048  ;;  %s1747_s6 = scalar_lea.hbm %s2595_s11, 4096 }
 0x64d   : > { %p1744_p13 = scmp.ne.s32.totalorder %s2440_s23, %s1743_s24  ;;  %p1748_p0 = scmp.lt.u32.totalorder %s2440_s23, %s2595_s11 }
 0x64e   : > { %p1749_p9 = scmp.lt.u32.totalorder %s1747_s6, %s1743_s24  ;;  %p1751_p1 = scmp.lt.u32.totalorder %s1743_s24, %s2440_s23 }
 0x64f   : > { %p1745_p3 = pnand %p1744_p13, %p2594_p4 }
 0x650   : > { %p1750_p10 = por %p1749_p9, %p1748_p0 }
 0x651   : > { %p1746_p6 = pneg %p1745_p3 }
 0x652   : > { %p1752_p7 = por %p1751_p1, %p1750_p10 }
 0x654   : > { %p1753_p2 = pnand %p1752_p7, %p1746_p6 }
 0x656   : > { %1756 = shalt.err (!%p1753_p2)
}
 0x657   : > { %s1878_s13 = smov 64   ;;  %v977_v51 = vcvt.s32.f32 %v2250_v32  ;;  %vm992_vm2 = vcmask 15360   ;;  %vm994_vm12 = vcmask 23552   ;;  %vm996_vm13 = vcmask 31744   ;;  %v989_v14 = vpop.permute.xlu1 %988  ;;  %s2596_s22 = sld [smem:[#allocation35_spill]] }
 0x658   : > { %1416 = dma.vmem_to_hbm [thread:$0]  (%p2594_p4), %s2443_s20, 2048, %s2440_s23, %s2412_s12, %s1878_s13, %s1878_s13, %s1873_s10   ;;  %vm998_vm14 = vcmask 39936   ;;  %vm1000_vm15 = vcmask 48128   ;;  %vm1002_vm1 = vcmask 56320  }
 0x659   : > { %v991_v61 = vsel %vm617_vm6, %v2248_v31, %v977_v51  ;;  %s1332_s10 = sshll.u32 %s1946_s9, 7  ;;  %s1029_s12 = sshll.u32 %s440_s21, 4  ;;  %s2480_s12 = int_to_ptr.vmem [resolvable:$true] %s1029_s12 }
 0x65a   : > { %v993_v5 = vsel %vm992_vm2, %v991_v61, %v2264_v36  ;;  %s1006_s9 = scalar_lea.sflag [#allocation9], %s2182_s3  ;;  %s1757_s20 = scalar_lea.vmem %s2480_s12, 128 }
 0x65b   : > { %p1758_p8 = scmp.ne.s32.totalorder %s2480_s12, %s1757_s20  ;;  %s1879_s19 = smov [#allocation18]  }
 0x65c   : > { %s1761_s8 = sshll.u32 %s1879_s19, 4  ;;  %s1762_s8 = int_to_ptr.vmem [resolvable:$false] %s1761_s8 }
 0x65d   : > { %s2478_s23 = scalar_lea.hbm %s2596_s22, %s1332_s10  ;;  %p1759_p12 = pnand %p1758_p8, %p2594_p4 }
 0x65e   : > { %s1763_s27 = scalar_lea.vmem %s1762_s8, 256  ;;  %p1764_p11 = scmp.lt.s32.totalorder %s2480_s12, %s1762_s8 }
 0x65f   : > { %p1760_p5 = pneg %p1759_p12  ;;  %p1765_p13 = scmp.lt.s32.totalorder %s1763_s27, %s1757_s20 }
 0x661   : > { %p1766_p3 = por %p1765_p13, %p1764_p11 }
 0x663   : > { %p1767_p6 = pnand %p1766_p3, %p1760_p5 }
 0x69f   : > { %v981_v63 = vpop.permute.xlu0 %980 }
 0x6a0   : > { %v995_v12 = vsel %vm994_vm12, %v993_v5, %v981_v63 }
 0x6a3   : > { %v985_v13 = vpop.permute.xlu0 %984 }
 0x6a4   : > { %v997_v32 = vsel %vm996_vm13, %v995_v12, %v985_v13 }
 0x6a5   : > { %v999_v15 = vsel %vm998_vm14, %v997_v32, %v985_v13 }
 0x6a6   : > { %v1001_v31 = vsel %vm1000_vm15, %v999_v15, %v989_v14 }
 0x6a7   : > { %v1003_v36 = vsel %vm1002_vm1, %v1001_v31, %v989_v14 }
 0x6a8   : > { %1004 = vst.msk [vmem:[%s440_s21] sm:$0xff] %vm597_vm10, %v1003_v36 }
 0x6a9   : > { %1770 = shalt.err (!%p1767_p6)
}
 0x6aa   : > { %s1771_s3 = scalar_lea.hbm %s2478_s23, 128  ;;  %s1775_s7 = scalar_lea.hbm %s2596_s22, 256 }
 0x6ab   : > { %p1772_p0 = scmp.ne.s32.totalorder %s2478_s23, %s1771_s3  ;;  %p1776_p1 = scmp.lt.u32.totalorder %s2478_s23, %s2596_s22 }
 0x6ac   : > { %p1777_p7 = scmp.lt.u32.totalorder %s1775_s7, %s1771_s3  ;;  %p1779_p8 = scmp.lt.u32.totalorder %s1771_s3, %s2478_s23 }
 0x6ad   : > { %p1773_p9 = pnand %p1772_p0, %p2594_p4 }
 0x6ae   : > { %p1778_p2 = por %p1777_p7, %p1776_p1 }
 0x6af   : > { %p1774_p10 = pneg %p1773_p9 }
 0x6b0   : > { %p1780_p12 = por %p1779_p8, %p1778_p2 }
 0x6b2   : > { %p1781_p5 = pnand %p1780_p12, %p1774_p10 }
 0x6b4   : > { %1784 = shalt.err (!%p1781_p5)
}
 0x6b5   : > { %1414 = dma.vmem_to_hbm [thread:$0]  (%p2594_p4), %s2480_s12, 128, %s2478_s23, %s1006_s9  }
 0x6b6 PF: > { %s2597_s1 = sld [smem:[#allocation28_spill]]  ;;  %s2598_s6 = sld [smem:[#allocation32_spill]] }
 0x6b7   : > { %p2600_p13 = scmp.ge.s32.totalorder %s1847_s30, 2 }
 0x6bc   : > { %s1073_s29 = sand.u32 1, %s2597_s1   ;;  %p2599_p11 = scmp.ne.s32.totalorder %s2598_s6, 0 }
 0x6bd   : > { %s1074_s15 = scalar_lea.sflag [#allocation9], %s1073_s29 }
 0x6be   : > { %p1441_p3 = pnand %p2600_p13, %p2599_p11 }
 0x6c0   : > { %1826 = dma.done.wait (!%p1441_p3), %s1074_s15, 128  }
 0x6c1   : > { %1828 = vsyncadd (!%p1441_p3), %s1074_s15, 4294967168  ;;  %s2601_s13 = sadd.s32 4294967294, %s1847_s30  }
 0x6c2   : > { %s1082_s10 = sand.u32 1, %s2601_s13  }
 0x6c3   : > { %s1083_s16 = scalar_lea.sflag [#allocation20], %s1082_s10 }
 0x6c4   : > { %1830 = dma.done.wait (!%p1441_p3), %s1083_s16, 2560  }
 0x6c5   : > { %1832 = vsyncadd (!%p1441_p3), %s1083_s16, 4294964736  ;;  %s2602_s30 = sld [smem:[#allocation30_spill]]  ;;  %s2603_s17 = sld [smem:[#allocation29_spill]] }
 0x6c6   : > { %s2604_s29 = sld [smem:[#allocation31_spill]]  ;;  %s2605_s27 = smov %s1839_s28 }
 0x6cb   : > { %p30_p4 = scmp.ge.s32.totalorder %s2602_s30, 4   ;;  %s2606_s28 = smov %s2603_s17 }
 0x6cd   :  { %32 = sbr.rel (!%p30_p4) target bundleno = 17 (0x11), region = 198 }
 0x6d4   :  { %1097 = vsyncpa [#allocation8], 1 }
 0x6d5   :  { %1099 = vsyncpa [#allocation8 + $0x1], 1 }
 0x6d6   :  { %1100 = vsyncpa [#allocation11], 1 }
 0x6d7   :  { %1102 = vsyncpa [#allocation11 + $0x1], 1 }
 0x6d8   :  { %1103 = vsyncpa [#allocation14], 1 }
 0x6d9   :  { %1104 = vsyncpa [#allocation17], 1 }
 0x6da   :  { %1105 = vsyncpa [#allocation9], 1 }
 0x6db   :  { %1107 = vsyncpa [#allocation9 + $0x1], 1 }
 0x6dc   :  { %1108 = vsyncpa [#allocation20], 1 }
 0x6dd   :  { %1110 = vsyncpa [#allocation20 + $0x1], 1 }

</bundles_post_ra>
